<compile_context>
chip_gen: v7x
topology: tpu7x:2x2x1
jax: 0.10.0
libtpu: 0.0.40
codegen_flags: <defaults>
</compile_context>

<pallas_src>
import jax
import jax.numpy as jnp
from jax.experimental import pallas as pl
from jax.experimental.pallas import tpu as pltpu

# ---- static configuration -------------------------------------------------
HID = 32            # args.hidden_size
GROUPS = 4          # nn.GroupNorm(4, hid)
N_FEAT = 64         # args.FEATURE_SIZE == number of 'feature' nodes
N_CELL = 16         # number of 'cell' nodes
BATCH_NUM = 4       # args.BATCH_NUM
CONV_LAYERS = 2     # args.conv_layers
N_EDGES = 3         # ['feature2cell', 'cell2feature', 'pathway']
EPS = 1e-5          # GroupNorm eps (PyTorch default)
NEG_SLOPE = 0.01    # F.leaky_relu default

# ---- W32 slab (lane width = HID) row offsets, all weight blocks 8-aligned ----
P32_R = 0                                   # (HID, HID) fused GroupNorm averaging matrix
EXTRA_W_R = P32_R + HID                     # (BATCH_NUM, HID) extra_encoder weight (padded 4->8)
IN_W_R = EXTRA_W_R + 8                      # (2*HID, HID) fused input_linears: [in_W[1]; in_W[0]]
WCELL_R = IN_W_R + 2 * HID                  # CONV_LAYERS x (2*HID, HID) fused SAGE self|neigh (cell)
ATTW_R = WCELL_R + CONV_LAYERS * 2 * HID    # CONV_LAYERS x (2*HID, HID) att_linears
BIAS32_R = ATTW_R + CONV_LAYERS * 2 * HID   # bias/gamma/beta rows (aligned start)
#  rows inside the 32-wide bias block:
EXTRA_B = 0
IN_B = 1          # 2 rows  (row 0: cell branch, row 1: feature branch)
IN_G = 3          # 2 rows
IN_BETA = 5       # 2 rows
BCELL = 7         # 2 rows
GCELL = 9         # 2 rows
BETACELL = 11     # 2 rows
ATTB = 13         # 2 rows
BIAS32_ROWS = 15
W32_ROWS = BIAS32_R + BIAS32_ROWS           # 375

# ---- W64 slab (lane width = 2*HID) row offsets ----
P64_R = 0                                   # (2H, 2H) block-diag GroupNorm averaging matrix
WFEAT_R = P64_R + 2 * HID                   # CONV_LAYERS x (4*HID, 2*HID) fused + K-padded feature SAGE
BIAS64_R = WFEAT_R + CONV_LAYERS * 4 * HID  # bias/gamma/beta rows (aligned start)
BFEAT = 0         # 2 rows
GFEAT = 2         # 2 rows
BETAFEAT = 4      # 2 rows
BIAS64_ROWS = 6
W64_ROWS = BIAS64_R + BIAS64_ROWS           # 326

# Stacked-GroupNorm stat row offsets (shared by init and conv-layer fusions)
S1 = N_FEAT                   # 64  : end of feature block
S2 = N_FEAT + N_CELL          # 80  : end of cell block
S3 = S2 + N_FEAT              # 144 : end of feature-squared block
S4 = S3 + N_CELL              # 160 : end of cell-squared block


# ---- Pallas kernel --------------------------------------------------------
def _scmogcn_kernel(feat_emb_ref, cell_in_ref, w32_ref, w64_ref, a_blk_ref, out_ref):
    f32 = jnp.float32

    def dot(a, b):
        return jnp.dot(a, b, preferred_element_type=f32)

    def lrelu(x):
        return jnp.where(x >= 0, x, NEG_SLOPE * x)

    def gelu(x):                               # exact erf form (nn.GELU default)
        return 0.5 * x * (1.0 + jax.lax.erf(x * 0.7071067811865476))

    # small bias / gamma / beta blocks: one aligned load each, rows sliced from the array
    b32 = w32_ref[BIAS32_R:BIAS32_R + BIAS32_ROWS, :]          # (15, 32)
    b64 = w64_ref[BIAS64_R:BIAS64_R + BIAS64_ROWS, :]          # (6, 64)
    r32 = lambda i: b32[i:i + 1, :]
    r64 = lambda i: b64[i:i + 1, :]

    P32 = w32_ref[P32_R:P32_R + HID, :]                        # (32, 32)
    P64 = w64_ref[P64_R:P64_R + 2 * HID, :]                    # (64, 64)

    zf32 = jnp.zeros((N_FEAT, HID), f32)                       # lane/K padding blocks (hoisted)
    zc32 = jnp.zeros((N_CELL, HID), f32)

    # ---- calculate_initial_embedding ----
    input1 = lrelu(feat_emb_ref[...])                                     # (64, 32)
    cell_in = cell_in_ref[...]                                            # (16, 36)
    input2 = lrelu(cell_in[:, :HID]) + lrelu(
        dot(cell_in[:, HID:HID + BATCH_NUM],
            w32_ref[EXTRA_W_R:EXTRA_W_R + BATCH_NUM, :]) + r32(EXTRA_B))  # (16, 32)

    # both input_linears in ONE matmul: [input1|0 ; 0|input2] (80,64) @ [W_feat; W_cell] (64,32)
    lin_lhs = jnp.concatenate(
        [jnp.concatenate([input1, zf32], axis=1),
         jnp.concatenate([zc32, input2], axis=1)], axis=0)                # (80, 64)
    lin = dot(lin_lhs, w32_ref[IN_W_R:IN_W_R + 2 * HID, :])               # (80, 32)
    gfeat = gelu(lin[:N_FEAT] + r32(IN_B + 1))                            # feature branch
    gcell = gelu(lin[N_FEAT:] + r32(IN_B))                                # cell branch

    # shared initial GroupNorm: ONE stats matmul for both branches, mean & E[x^2] together
    st0 = dot(jnp.concatenate([gfeat, gcell, gfeat * gfeat, gcell * gcell], axis=0), P32)
    mu_f, mu_c = st0[:S1], st0[S1:S2]
    ex_f, ex_c = st0[S2:S3], st0[S3:S4]
    hfeat = (gfeat - mu_f) * jax.lax.rsqrt(ex_f - mu_f * mu_f + EPS) * r32(IN_G + 1) + r32(IN_BETA + 1)
    hcell = (gcell - mu_c) * jax.lax.rsqrt(ex_c - mu_c * mu_c + EPS) * r32(IN_G) + r32(IN_BETA)

    # ---- propagate: conv layers (residual='none') ----
    cell_outs = []
    for l in range(CONV_LAYERS):
        # all three mean-aggregated messages in ONE block-diagonal adjacency matmul
        msgs = dot(a_blk_ref[...], jnp.concatenate([hfeat, hcell], axis=0))   # (144, 32)
        msg_f2c = msgs[:N_CELL, :]                     # feature -> cell
        msg_pw = msgs[N_CELL:N_CELL + N_FEAT, :]       # pathway  (feature -> feature)
        msg_c2f = msgs[N_CELL + N_FEAT:, :]            # cell -> feature

        # cell-target SAGEConv: self | neighbour weights fused into one (2H, H) matmul
        wc = WCELL_R + l * 2 * HID
        h_cell_raw = (dot(jnp.concatenate([hcell, msg_f2c], axis=1),
                          w32_ref[wc:wc + 2 * HID, :]) + r32(BCELL + l))       # (16, 32)

        # both feature-target relations fused, K padded 96->128: [h1_raw | h2_raw]
        wf = WFEAT_R + l * 4 * HID
        h12_raw = (dot(jnp.concatenate([hfeat, msg_c2f, msg_pw, zf32], axis=1),
                       w64_ref[wf:wf + 4 * HID, :]) + r64(BFEAT + l))          # (64, 64)

        # ONE fused GroupNorm stats matmul for h1|h2 and cell: stack [x ; x^2] along sublanes
        cellpad = jnp.concatenate([h_cell_raw, zc32], axis=1)                  # (16, 64)
        st = dot(jnp.concatenate(
            [h12_raw, cellpad, h12_raw * h12_raw, cellpad * cellpad], axis=0), P64)
        mu12, muc = st[:S1], st[S1:S2, :HID]
        ex12, exc = st[S2:S3], st[S3:S4, :HID]

        # pathway_aggregation='cat': normalized halves feed att_linear directly
        h12 = (h12_raw - mu12) * jax.lax.rsqrt(ex12 - mu12 * mu12 + EPS) * r64(GFEAT + l) + r64(BETAFEAT + l)
        wa = ATTW_R + l * 2 * HID
        hfeat = gelu(dot(h12, w32_ref[wa:wa + 2 * HID, :]) + r32(ATTB + l))    # conv_acts[2l]

        hcell = gelu((h_cell_raw - muc) * jax.lax.rsqrt(exc - muc * muc + EPS)
                     * r32(GCELL + l) + r32(BETACELL + l))                     # conv_acts[2l+1]
        cell_outs.append(hcell)

    # encode(): readout concat of per-layer cell states — one lane-dense store
    out_ref[...] = jnp.concatenate(cell_outs, axis=1).astype(out_ref.dtype)


def scmogcn_forward(packed):
    return pl.pallas_call(
        _scmogcn_kernel,
        out_shape=jax.ShapeDtypeStruct((N_CELL, CONV_LAYERS * HID), jnp.float32),
        in_specs=[pl.BlockSpec(memory_space=pltpu.MemorySpace.VMEM)] * len(packed),
        out_specs=pl.BlockSpec(memory_space=pltpu.MemorySpace.VMEM),
    )(*packed)


# ---- pure-JAX reference (original, unfused math; validates the packing too) ----
def _reference_forward(p):
    f32 = jnp.float32
    dot = lambda a, b: jnp.dot(a, b, preferred_element_type=f32)
    lrelu = lambda x: jnp.where(x >= 0, x, NEG_SLOPE * x)
    gelu = lambda x: 0.5 * x * (1.0 + jax.lax.erf(x * 0.7071067811865476))

    group_of = jnp.arange(HID) // (HID // GROUPS)
    bcast = (group_of[None, :] == jnp.arange(GROUPS)[:, None]).astype(f32)   # (G, HID)
    pool = bcast.T / float(HID // GROUPS)                                    # (HID, G)

    def group_norm(x, gamma, beta):
        mu = dot(dot(x, pool), bcast)
        var = dot(dot(x * x, pool), bcast) - mu * mu
        return (x - mu) * jax.lax.rsqrt(var + EPS) * gamma + beta

    input1 = lrelu(p['feat_emb'])
    input2 = lrelu(p['cell_emb']) + lrelu(dot(p['bf'], p['extra_W']) + p['extra_b'])

    hfeat = group_norm(gelu(dot(input1, p['in_W'][1]) + p['in_b'][1]),
                       p['in_g'][1], p['in_beta'][1])
    hcell = group_norm(gelu(dot(input2, p['in_W'][0]) + p['in_b'][0]),
                       p['in_g'][0], p['in_beta'][0])

    cell_hist = []
    for l in range(CONV_LAYERS):
        def sage(h_dst, h_neigh, e, _l=l):
            return (dot(h_dst, p['sage_Ws'][_l, e]) + dot(h_neigh, p['sage_Wn'][_l, e])
                    + p['sage_b'][_l, e])

        h_cell_raw = sage(hcell, dot(p['A_f2c'], hfeat), 0)     # feature2cell
        h1_raw = sage(hfeat, dot(p['A_c2f'], hcell), 1)         # cell2feature
        h2_raw = sage(hfeat, dot(p['A_pw'], hfeat), 2)          # pathway

        h1 = group_norm(h1_raw, p['cn_g'][l, 1], p['cn_b'][l, 1])
        h2 = group_norm(h2_raw, p['cn_g'][l, 2], p['cn_b'][l, 2])
        feat_agg = dot(jnp.concatenate([h1, h2], axis=1), p['att_W'][l]) + p['att_b'][l]

        hfeat = gelu(feat_agg)
        hcell = gelu(group_norm(h_cell_raw, p['cn_g'][l, 0], p['cn_b'][l, 0]))
        cell_hist.append(hcell)

    return jnp.concatenate(cell_hist, axis=1)


# ---- glue: deterministic params / synthetic graph / slab packing -----------
def build_params(key):
    ks = iter(jax.random.split(key, 24))
    f32 = jnp.float32

    def nrm(shape, scale=0.1):
        return scale * jax.random.normal(next(ks), shape, f32)

    embed_feat_table = nrm((N_FEAT, HID))            # nn.Embedding(FEATURE_SIZE, hid)
    embed_cell_table = nrm((2, HID))                 # nn.Embedding(2, hid)  (cell_init='none')
    feat_ids = jnp.arange(N_FEAT) % N_FEAT
    cell_ids = jnp.arange(N_CELL) % 2

    p = dict(
        feat_emb=embed_feat_table[feat_ids],         # embedding gather done in glue
        cell_emb=embed_cell_table[cell_ids],
        bf=jax.random.normal(next(ks), (N_CELL, BATCH_NUM), f32),
        extra_W=nrm((BATCH_NUM, HID)),
        extra_b=nrm((HID,), 0.01),
        in_W=nrm((2, HID, HID)),
        in_b=nrm((2, HID), 0.01),
        in_g=jnp.ones((2, HID), f32),
        in_beta=jnp.zeros((2, HID), f32),
        sage_Ws=nrm((CONV_LAYERS, N_EDGES, HID, HID)),
        sage_Wn=nrm((CONV_LAYERS, N_EDGES, HID, HID)),
        sage_b=nrm((CONV_LAYERS, N_EDGES, HID), 0.01),
        cn_g=jnp.ones((CONV_LAYERS, N_EDGES, HID), f32),
        cn_b=jnp.zeros((CONV_LAYERS, N_EDGES, HID), f32),
        att_W=nrm((CONV_LAYERS, 2 * HID, HID)),
        att_b=nrm((CONV_LAYERS, HID), 0.01),
    )

    # Dense normalized adjacency: A[dst, src] = weight / in_degree(dst) (SAGE 'mean')
    def make_adj(k, n_dst, n_src, prob=0.35):
        k1, k2 = jax.random.split(k)
        mask = (jax.random.uniform(k1, (n_dst, n_src)) < prob).astype(f32)
        w = jax.random.uniform(k2, (n_dst, n_src), minval=0.1, maxval=1.0)
        deg = jnp.maximum(jnp.sum(mask, axis=1, keepdims=True), 1.0)
        return (mask * w) / deg

    p['A_f2c'] = make_adj(next(ks), N_CELL, N_FEAT)  # feature -> cell
    p['A_c2f'] = make_adj(next(ks), N_FEAT, N_CELL)  # cell -> feature
    p['A_pw'] = make_adj(next(ks), N_FEAT, N_FEAT)   # feature -> feature (pathway)
    return p


def pack_params(p):
    f32 = jnp.float32

    # fused block-diagonal GroupNorm averaging matrices
    group_of = jnp.arange(HID) // (HID // GROUPS)
    P32 = (group_of[:, None] == group_of[None, :]).astype(f32) / float(HID // GROUPS)
    Z = jnp.zeros((HID, HID), f32)
    P64 = jnp.concatenate([jnp.concatenate([P32, Z], axis=1),
                           jnp.concatenate([Z, P32], axis=1)], axis=0)

    Ws, Wn, sb = p['sage_Ws'], p['sage_Wn'], p['sage_b']

    w32_rows = [P32,
                p['extra_W'], jnp.zeros((4, HID), f32),            # pad extra_W 4 -> 8
                p['in_W'][1], p['in_W'][0]]                        # fused input_linears (feat K-block first)
    for l in range(CONV_LAYERS):                                   # fused cell-target SAGE weights
        w32_rows.append(jnp.concatenate([Ws[l, 0], Wn[l, 0]], axis=0))
    for l in range(CONV_LAYERS):                                   # att_linears
        w32_rows.append(p['att_W'][l])
    w32_rows += [p['extra_b'][None, :],
                 p['in_b'], p['in_g'], p['in_beta'],
                 sb[:, 0, :], p['cn_g'][:, 0, :], p['cn_b'][:, 0, :],
                 p['att_b']]
    w32 = jnp.concatenate(w32_rows, axis=0)

    w64_rows = [P64]
    for l in range(CONV_LAYERS):                                   # fused + K-padded feature-target weights
        top = jnp.concatenate([Ws[l, 1], Ws[l, 2]], axis=1)        # self weights (dst = hfeat)
        mid = jnp.concatenate([Wn[l, 1], Z], axis=1)               # neighbour (cell2feature)
        bot = jnp.concatenate([Z, Wn[l, 2]], axis=1)               # neighbour (pathway)
        pad = jnp.zeros((HID, 2 * HID), f32)                       # K padding 96 -> 128
        w64_rows.append(jnp.concatenate([top, mid, bot, pad], axis=0))  # (128, 64)
    w64_rows += [jnp.concatenate([sb[:, 1, :], sb[:, 2, :]], axis=1),
                 jnp.concatenate([p['cn_g'][:, 1, :], p['cn_g'][:, 2, :]], axis=1),
                 jnp.concatenate([p['cn_b'][:, 1, :], p['cn_b'][:, 2, :]], axis=1)]
    w64 = jnp.concatenate(w64_rows, axis=0)

    assert w32.shape == (W32_ROWS, HID), w32.shape
    assert w64.shape == (W64_ROWS, 2 * HID), w64.shape

    # block-diagonal adjacency over sources [features | cells]:
    #   rows [f2c (16) ; pw (64) ; c2f (64)]  ->  (144, 80)
    a_blk = jnp.concatenate([
        jnp.concatenate([p['A_f2c'], jnp.zeros((N_CELL, N_CELL), f32)], axis=1),
        jnp.concatenate([p['A_pw'], jnp.zeros((N_FEAT, N_CELL), f32)], axis=1),
        jnp.concatenate([jnp.zeros((N_FEAT, N_FEAT), f32), p['A_c2f']], axis=1)], axis=0)
    assert a_blk.shape == (N_CELL + 2 * N_FEAT, N_FEAT + N_CELL), a_blk.shape

    cell_in = jnp.concatenate([p['cell_emb'], p['bf']], axis=1)    # (N_CELL, HID+BATCH_NUM)

    return (p['feat_emb'], cell_in, w32, w64, a_blk)


if __name__ == "__main__":
    params = build_params(jax.random.PRNGKey(0))
    packed = pack_params(params)

    out = jax.block_until_ready(scmogcn_forward(packed))
    ref = jax.block_until_ready(jax.jit(_reference_forward)(params))

    assert out.shape == (N_CELL, CONV_LAYERS * HID), out.shape
    assert bool(jnp.all(jnp.isfinite(out)))
    max_err = float(jnp.max(jnp.abs(out - ref)))
    assert bool(jnp.allclose(out, ref, rtol=1e-4, atol=1e-4)), max_err

    print("KERNEL_OK")
</pallas_src>

<mosaic_0001>
module attributes {stable_mosaic.version = 11 : i64} {
  func.func @_scmogcn_kernel(%arg0: memref<64x32xf32, #tpu.memory_space<vmem>>, %arg1: memref<16x36xf32, #tpu.memory_space<vmem>>, %arg2: memref<375x32xf32, #tpu.memory_space<vmem>>, %arg3: memref<326x64xf32, #tpu.memory_space<vmem>>, %arg4: memref<144x80xf32, #tpu.memory_space<vmem>>, %arg5: memref<16x64xf32, #tpu.memory_space<vmem>>) attributes {dimension_semantics = [], scalar_prefetch = 0 : i64, scratch_operands = 0 : i64, tpu.core_type = #tpu.core_type<tc>} {
    %c360 = arith.constant 360 : index
    %c0 = arith.constant 0 : index
    %0 = vector.load %arg2[%c360, %c0] : memref<375x32xf32, #tpu.memory_space<vmem>>, vector<15x32xf32>
    %c320 = arith.constant 320 : index
    %c0_0 = arith.constant 0 : index
    %1 = vector.load %arg3[%c320, %c0_0] : memref<326x64xf32, #tpu.memory_space<vmem>>, vector<6x64xf32>
    %c0_1 = arith.constant 0 : index
    %c0_2 = arith.constant 0 : index
    %2 = vector.load %arg2[%c0_1, %c0_2] : memref<375x32xf32, #tpu.memory_space<vmem>>, vector<32x32xf32>
    %c0_3 = arith.constant 0 : index
    %c0_4 = arith.constant 0 : index
    %3 = vector.load %arg3[%c0_3, %c0_4] : memref<326x64xf32, #tpu.memory_space<vmem>>, vector<64x64xf32>
    %cst = arith.constant 0.000000e+00 : f32
    %4 = vector.broadcast %cst : f32 to vector<64x32xf32>
    %cst_5 = arith.constant 0.000000e+00 : f32
    %5 = vector.broadcast %cst_5 : f32 to vector<16x32xf32>
    %c0_6 = arith.constant 0 : index
    %c0_7 = arith.constant 0 : index
    %6 = vector.load %arg0[%c0_6, %c0_7] : memref<64x32xf32, #tpu.memory_space<vmem>>, vector<64x32xf32>
    %cst_8 = arith.constant 0.000000e+00 : f32
    %7 = vector.broadcast %cst_8 : f32 to vector<64x32xf32>
    %8 = arith.cmpf oge, %6, %7 : vector<64x32xf32>
    %cst_9 = arith.constant 0.00999999977 : f32
    %9 = vector.broadcast %cst_9 : f32 to vector<64x32xf32>
    %10 = arith.mulf %9, %6 : vector<64x32xf32>
    %11 = arith.select %8, %6, %10 : vector<64x32xi1>, vector<64x32xf32>
    %c0_10 = arith.constant 0 : index
    %c0_11 = arith.constant 0 : index
    %12 = vector.load %arg1[%c0_10, %c0_11] : memref<16x36xf32, #tpu.memory_space<vmem>>, vector<16x36xf32>
    %13 = vector.extract_strided_slice %12 {offsets = [0, 0], sizes = [16, 32], strides = [1, 1]} : vector<16x36xf32> to vector<16x32xf32>
    %cst_12 = arith.constant 0.000000e+00 : f32
    %14 = vector.broadcast %cst_12 : f32 to vector<16x32xf32>
    %15 = arith.cmpf oge, %13, %14 : vector<16x32xf32>
    %cst_13 = arith.constant 0.00999999977 : f32
    %16 = vector.broadcast %cst_13 : f32 to vector<16x32xf32>
    %17 = arith.mulf %16, %13 : vector<16x32xf32>
    %18 = arith.select %15, %13, %17 : vector<16x32xi1>, vector<16x32xf32>
    %19 = vector.extract_strided_slice %12 {offsets = [0, 32], sizes = [16, 4], strides = [1, 1]} : vector<16x36xf32> to vector<16x4xf32>
    %c32 = arith.constant 32 : index
    %c0_14 = arith.constant 0 : index
    %20 = vector.load %arg2[%c32, %c0_14] : memref<375x32xf32, #tpu.memory_space<vmem>>, vector<4x32xf32>
    %cst_15 = arith.constant dense<0.000000e+00> : vector<16x32xf32>
    %21 = tpu.matmul %19, %20, %cst_15 {dimension_numbers = #tpu.dot_dimension_numbers<[1], [0], [0], [1], [0, 0, 1, 1], [], []>} : vector<16x4xf32>, vector<4x32xf32>, vector<16x32xf32> -> vector<16x32xf32>
    %22 = vector.extract_strided_slice %0 {offsets = [0, 0], sizes = [1, 32], strides = [1, 1]} : vector<15x32xf32> to vector<1x32xf32>
    %23 = vector.broadcast %22 : vector<1x32xf32> to vector<16x32xf32>
    %24 = arith.addf %21, %23 : vector<16x32xf32>
    %cst_16 = arith.constant 0.000000e+00 : f32
    %25 = vector.broadcast %cst_16 : f32 to vector<16x32xf32>
    %26 = arith.cmpf oge, %24, %25 : vector<16x32xf32>
    %cst_17 = arith.constant 0.00999999977 : f32
    %27 = vector.broadcast %cst_17 : f32 to vector<16x32xf32>
    %28 = arith.mulf %27, %24 : vector<16x32xf32>
    %29 = arith.select %26, %24, %28 : vector<16x32xi1>, vector<16x32xf32>
    %30 = arith.addf %18, %29 : vector<16x32xf32>
    %31 = tpu.concatenate %11, %4 in 1 : vector<64x32xf32>, vector<64x32xf32> -> vector<64x64xf32>
    %32 = tpu.concatenate %5, %30 in 1 : vector<16x32xf32>, vector<16x32xf32> -> vector<16x64xf32>
    %33 = tpu.concatenate %31, %32 in 0 : vector<64x64xf32>, vector<16x64xf32> -> vector<80x64xf32>
    %c40 = arith.constant 40 : index
    %c0_18 = arith.constant 0 : index
    %34 = vector.load %arg2[%c40, %c0_18] : memref<375x32xf32, #tpu.memory_space<vmem>>, vector<64x32xf32>
    %cst_19 = arith.constant dense<0.000000e+00> : vector<80x32xf32>
    %35 = tpu.matmul %33, %34, %cst_19 {dimension_numbers = #tpu.dot_dimension_numbers<[1], [0], [0], [1], [0, 0, 1, 1], [], []>} : vector<80x64xf32>, vector<64x32xf32>, vector<80x32xf32> -> vector<80x32xf32>
    %36 = vector.extract_strided_slice %35 {offsets = [0, 0], sizes = [64, 32], strides = [1, 1]} : vector<80x32xf32> to vector<64x32xf32>
    %37 = vector.extract_strided_slice %0 {offsets = [2, 0], sizes = [1, 32], strides = [1, 1]} : vector<15x32xf32> to vector<1x32xf32>
    %38 = vector.broadcast %37 : vector<1x32xf32> to vector<64x32xf32>
    %39 = arith.addf %36, %38 : vector<64x32xf32>
    %cst_20 = arith.constant 5.000000e-01 : f32
    %40 = vector.broadcast %cst_20 : f32 to vector<64x32xf32>
    %41 = arith.mulf %40, %39 : vector<64x32xf32>
    %cst_21 = arith.constant 0.707106769 : f32
    %42 = vector.broadcast %cst_21 : f32 to vector<64x32xf32>
    %43 = arith.mulf %39, %42 : vector<64x32xf32>
    %44 = math.erf %43 : vector<64x32xf32>
    %cst_22 = arith.constant 1.000000e+00 : f32
    %45 = vector.broadcast %cst_22 : f32 to vector<64x32xf32>
    %46 = arith.addf %45, %44 : vector<64x32xf32>
    %47 = arith.mulf %41, %46 : vector<64x32xf32>
    %48 = vector.extract_strided_slice %35 {offsets = [64, 0], sizes = [16, 32], strides = [1, 1]} : vector<80x32xf32> to vector<16x32xf32>
    %49 = vector.extract_strided_slice %0 {offsets = [1, 0], sizes = [1, 32], strides = [1, 1]} : vector<15x32xf32> to vector<1x32xf32>
    %50 = vector.broadcast %49 : vector<1x32xf32> to vector<16x32xf32>
    %51 = arith.addf %48, %50 : vector<16x32xf32>
    %cst_23 = arith.constant 5.000000e-01 : f32
    %52 = vector.broadcast %cst_23 : f32 to vector<16x32xf32>
    %53 = arith.mulf %52, %51 : vector<16x32xf32>
    %cst_24 = arith.constant 0.707106769 : f32
    %54 = vector.broadcast %cst_24 : f32 to vector<16x32xf32>
    %55 = arith.mulf %51, %54 : vector<16x32xf32>
    %56 = math.erf %55 : vector<16x32xf32>
    %cst_25 = arith.constant 1.000000e+00 : f32
    %57 = vector.broadcast %cst_25 : f32 to vector<16x32xf32>
    %58 = arith.addf %57, %56 : vector<16x32xf32>
    %59 = arith.mulf %53, %58 : vector<16x32xf32>
    %60 = arith.mulf %47, %47 : vector<64x32xf32>
    %61 = arith.mulf %59, %59 : vector<16x32xf32>
    %62 = tpu.concatenate %47, %59, %60, %61 in 0 : vector<64x32xf32>, vector<16x32xf32>, vector<64x32xf32>, vector<16x32xf32> -> vector<160x32xf32>
    %cst_26 = arith.constant dense<0.000000e+00> : vector<160x32xf32>
    %63 = tpu.matmul %62, %2, %cst_26 {dimension_numbers = #tpu.dot_dimension_numbers<[1], [0], [0], [1], [0, 0, 1, 1], [], []>} : vector<160x32xf32>, vector<32x32xf32>, vector<160x32xf32> -> vector<160x32xf32>
    %64 = vector.extract_strided_slice %63 {offsets = [0, 0], sizes = [64, 32], strides = [1, 1]} : vector<160x32xf32> to vector<64x32xf32>
    %65 = vector.extract_strided_slice %63 {offsets = [64, 0], sizes = [16, 32], strides = [1, 1]} : vector<160x32xf32> to vector<16x32xf32>
    %66 = vector.extract_strided_slice %63 {offsets = [80, 0], sizes = [64, 32], strides = [1, 1]} : vector<160x32xf32> to vector<64x32xf32>
    %67 = vector.extract_strided_slice %63 {offsets = [144, 0], sizes = [16, 32], strides = [1, 1]} : vector<160x32xf32> to vector<16x32xf32>
    %68 = arith.subf %47, %64 : vector<64x32xf32>
    %69 = arith.mulf %64, %64 : vector<64x32xf32>
    %70 = arith.subf %66, %69 : vector<64x32xf32>
    %cst_27 = arith.constant 9.99999974E-6 : f32
    %71 = vector.broadcast %cst_27 : f32 to vector<64x32xf32>
    %72 = arith.addf %70, %71 : vector<64x32xf32>
    %73 = math.rsqrt %72 : vector<64x32xf32>
    %74 = arith.mulf %68, %73 : vector<64x32xf32>
    %75 = vector.extract_strided_slice %0 {offsets = [4, 0], sizes = [1, 32], strides = [1, 1]} : vector<15x32xf32> to vector<1x32xf32>
    %76 = vector.broadcast %75 : vector<1x32xf32> to vector<64x32xf32>
    %77 = arith.mulf %74, %76 : vector<64x32xf32>
    %78 = vector.extract_strided_slice %0 {offsets = [6, 0], sizes = [1, 32], strides = [1, 1]} : vector<15x32xf32> to vector<1x32xf32>
    %79 = vector.broadcast %78 : vector<1x32xf32> to vector<64x32xf32>
    %80 = arith.addf %77, %79 : vector<64x32xf32>
    %81 = arith.subf %59, %65 : vector<16x32xf32>
    %82 = arith.mulf %65, %65 : vector<16x32xf32>
    %83 = arith.subf %67, %82 : vector<16x32xf32>
    %cst_28 = arith.constant 9.99999974E-6 : f32
    %84 = vector.broadcast %cst_28 : f32 to vector<16x32xf32>
    %85 = arith.addf %83, %84 : vector<16x32xf32>
    %86 = math.rsqrt %85 : vector<16x32xf32>
    %87 = arith.mulf %81, %86 : vector<16x32xf32>
    %88 = vector.extract_strided_slice %0 {offsets = [3, 0], sizes = [1, 32], strides = [1, 1]} : vector<15x32xf32> to vector<1x32xf32>
    %89 = vector.broadcast %88 : vector<1x32xf32> to vector<16x32xf32>
    %90 = arith.mulf %87, %89 : vector<16x32xf32>
    %91 = vector.extract_strided_slice %0 {offsets = [5, 0], sizes = [1, 32], strides = [1, 1]} : vector<15x32xf32> to vector<1x32xf32>
    %92 = vector.broadcast %91 : vector<1x32xf32> to vector<16x32xf32>
    %93 = arith.addf %90, %92 : vector<16x32xf32>
    %c0_29 = arith.constant 0 : index
    %c0_30 = arith.constant 0 : index
    %94 = vector.load %arg4[%c0_29, %c0_30] : memref<144x80xf32, #tpu.memory_space<vmem>>, vector<144x80xf32>
    %95 = tpu.concatenate %80, %93 in 0 : vector<64x32xf32>, vector<16x32xf32> -> vector<80x32xf32>
    %cst_31 = arith.constant dense<0.000000e+00> : vector<144x32xf32>
    %96 = tpu.matmul %94, %95, %cst_31 {dimension_numbers = #tpu.dot_dimension_numbers<[1], [0], [0], [1], [0, 0, 1, 1], [], []>} : vector<144x80xf32>, vector<80x32xf32>, vector<144x32xf32> -> vector<144x32xf32>
    %97 = vector.extract_strided_slice %96 {offsets = [0, 0], sizes = [16, 32], strides = [1, 1]} : vector<144x32xf32> to vector<16x32xf32>
    %98 = vector.extract_strided_slice %96 {offsets = [16, 0], sizes = [64, 32], strides = [1, 1]} : vector<144x32xf32> to vector<64x32xf32>
    %99 = vector.extract_strided_slice %96 {offsets = [80, 0], sizes = [64, 32], strides = [1, 1]} : vector<144x32xf32> to vector<64x32xf32>
    %100 = tpu.concatenate %93, %97 in 1 : vector<16x32xf32>, vector<16x32xf32> -> vector<16x64xf32>
    %c104 = arith.constant 104 : index
    %c0_32 = arith.constant 0 : index
    %101 = vector.load %arg2[%c104, %c0_32] : memref<375x32xf32, #tpu.memory_space<vmem>>, vector<64x32xf32>
    %cst_33 = arith.constant dense<0.000000e+00> : vector<16x32xf32>
    %102 = tpu.matmul %100, %101, %cst_33 {dimension_numbers = #tpu.dot_dimension_numbers<[1], [0], [0], [1], [0, 0, 1, 1], [], []>} : vector<16x64xf32>, vector<64x32xf32>, vector<16x32xf32> -> vector<16x32xf32>
    %103 = vector.extract_strided_slice %0 {offsets = [7, 0], sizes = [1, 32], strides = [1, 1]} : vector<15x32xf32> to vector<1x32xf32>
    %104 = vector.broadcast %103 : vector<1x32xf32> to vector<16x32xf32>
    %105 = arith.addf %102, %104 : vector<16x32xf32>
    %106 = tpu.concatenate %80, %99, %98, %4 in 1 : vector<64x32xf32>, vector<64x32xf32>, vector<64x32xf32>, vector<64x32xf32> -> vector<64x128xf32>
    %c64 = arith.constant 64 : index
    %c0_34 = arith.constant 0 : index
    %107 = vector.load %arg3[%c64, %c0_34] : memref<326x64xf32, #tpu.memory_space<vmem>>, vector<128x64xf32>
    %cst_35 = arith.constant dense<0.000000e+00> : vector<64x64xf32>
    %108 = tpu.matmul %106, %107, %cst_35 {dimension_numbers = #tpu.dot_dimension_numbers<[1], [0], [0], [1], [0, 0, 1, 1], [], []>} : vector<64x128xf32>, vector<128x64xf32>, vector<64x64xf32> -> vector<64x64xf32>
    %109 = vector.extract_strided_slice %1 {offsets = [0, 0], sizes = [1, 64], strides = [1, 1]} : vector<6x64xf32> to vector<1x64xf32>
    %110 = vector.broadcast %109 : vector<1x64xf32> to vector<64x64xf32>
    %111 = arith.addf %108, %110 : vector<64x64xf32>
    %112 = tpu.concatenate %105, %5 in 1 : vector<16x32xf32>, vector<16x32xf32> -> vector<16x64xf32>
    %113 = arith.mulf %111, %111 : vector<64x64xf32>
    %114 = arith.mulf %112, %112 : vector<16x64xf32>
    %115 = tpu.concatenate %111, %112, %113, %114 in 0 : vector<64x64xf32>, vector<16x64xf32>, vector<64x64xf32>, vector<16x64xf32> -> vector<160x64xf32>
    %cst_36 = arith.constant dense<0.000000e+00> : vector<160x64xf32>
    %116 = tpu.matmul %115, %3, %cst_36 {dimension_numbers = #tpu.dot_dimension_numbers<[1], [0], [0], [1], [0, 0, 1, 1], [], []>} : vector<160x64xf32>, vector<64x64xf32>, vector<160x64xf32> -> vector<160x64xf32>
    %117 = vector.extract_strided_slice %116 {offsets = [0, 0], sizes = [64, 64], strides = [1, 1]} : vector<160x64xf32> to vector<64x64xf32>
    %118 = vector.extract_strided_slice %116 {offsets = [64, 0], sizes = [16, 32], strides = [1, 1]} : vector<160x64xf32> to vector<16x32xf32>
    %119 = vector.extract_strided_slice %116 {offsets = [80, 0], sizes = [64, 64], strides = [1, 1]} : vector<160x64xf32> to vector<64x64xf32>
    %120 = vector.extract_strided_slice %116 {offsets = [144, 0], sizes = [16, 32], strides = [1, 1]} : vector<160x64xf32> to vector<16x32xf32>
    %121 = arith.subf %111, %117 : vector<64x64xf32>
    %122 = arith.mulf %117, %117 : vector<64x64xf32>
    %123 = arith.subf %119, %122 : vector<64x64xf32>
    %cst_37 = arith.constant 9.99999974E-6 : f32
    %124 = vector.broadcast %cst_37 : f32 to vector<64x64xf32>
    %125 = arith.addf %123, %124 : vector<64x64xf32>
    %126 = math.rsqrt %125 : vector<64x64xf32>
    %127 = arith.mulf %121, %126 : vector<64x64xf32>
    %128 = vector.extract_strided_slice %1 {offsets = [2, 0], sizes = [1, 64], strides = [1, 1]} : vector<6x64xf32> to vector<1x64xf32>
    %129 = vector.broadcast %128 : vector<1x64xf32> to vector<64x64xf32>
    %130 = arith.mulf %127, %129 : vector<64x64xf32>
    %131 = vector.extract_strided_slice %1 {offsets = [4, 0], sizes = [1, 64], strides = [1, 1]} : vector<6x64xf32> to vector<1x64xf32>
    %132 = vector.broadcast %131 : vector<1x64xf32> to vector<64x64xf32>
    %133 = arith.addf %130, %132 : vector<64x64xf32>
    %c232 = arith.constant 232 : index
    %c0_38 = arith.constant 0 : index
    %134 = vector.load %arg2[%c232, %c0_38] : memref<375x32xf32, #tpu.memory_space<vmem>>, vector<64x32xf32>
    %cst_39 = arith.constant dense<0.000000e+00> : vector<64x32xf32>
    %135 = tpu.matmul %133, %134, %cst_39 {dimension_numbers = #tpu.dot_dimension_numbers<[1], [0], [0], [1], [0, 0, 1, 1], [], []>} : vector<64x64xf32>, vector<64x32xf32>, vector<64x32xf32> -> vector<64x32xf32>
    %136 = vector.extract_strided_slice %0 {offsets = [13, 0], sizes = [1, 32], strides = [1, 1]} : vector<15x32xf32> to vector<1x32xf32>
    %137 = vector.broadcast %136 : vector<1x32xf32> to vector<64x32xf32>
    %138 = arith.addf %135, %137 : vector<64x32xf32>
    %cst_40 = arith.constant 5.000000e-01 : f32
    %139 = vector.broadcast %cst_40 : f32 to vector<64x32xf32>
    %140 = arith.mulf %139, %138 : vector<64x32xf32>
    %cst_41 = arith.constant 0.707106769 : f32
    %141 = vector.broadcast %cst_41 : f32 to vector<64x32xf32>
    %142 = arith.mulf %138, %141 : vector<64x32xf32>
    %143 = math.erf %142 : vector<64x32xf32>
    %cst_42 = arith.constant 1.000000e+00 : f32
    %144 = vector.broadcast %cst_42 : f32 to vector<64x32xf32>
    %145 = arith.addf %144, %143 : vector<64x32xf32>
    %146 = arith.mulf %140, %145 : vector<64x32xf32>
    %147 = arith.subf %105, %118 : vector<16x32xf32>
    %148 = arith.mulf %118, %118 : vector<16x32xf32>
    %149 = arith.subf %120, %148 : vector<16x32xf32>
    %cst_43 = arith.constant 9.99999974E-6 : f32
    %150 = vector.broadcast %cst_43 : f32 to vector<16x32xf32>
    %151 = arith.addf %149, %150 : vector<16x32xf32>
    %152 = math.rsqrt %151 : vector<16x32xf32>
    %153 = arith.mulf %147, %152 : vector<16x32xf32>
    %154 = vector.extract_strided_slice %0 {offsets = [9, 0], sizes = [1, 32], strides = [1, 1]} : vector<15x32xf32> to vector<1x32xf32>
    %155 = vector.broadcast %154 : vector<1x32xf32> to vector<16x32xf32>
    %156 = arith.mulf %153, %155 : vector<16x32xf32>
    %157 = vector.extract_strided_slice %0 {offsets = [11, 0], sizes = [1, 32], strides = [1, 1]} : vector<15x32xf32> to vector<1x32xf32>
    %158 = vector.broadcast %157 : vector<1x32xf32> to vector<16x32xf32>
    %159 = arith.addf %156, %158 : vector<16x32xf32>
    %cst_44 = arith.constant 5.000000e-01 : f32
    %160 = vector.broadcast %cst_44 : f32 to vector<16x32xf32>
    %161 = arith.mulf %160, %159 : vector<16x32xf32>
    %cst_45 = arith.constant 0.707106769 : f32
    %162 = vector.broadcast %cst_45 : f32 to vector<16x32xf32>
    %163 = arith.mulf %159, %162 : vector<16x32xf32>
    %164 = math.erf %163 : vector<16x32xf32>
    %cst_46 = arith.constant 1.000000e+00 : f32
    %165 = vector.broadcast %cst_46 : f32 to vector<16x32xf32>
    %166 = arith.addf %165, %164 : vector<16x32xf32>
    %167 = arith.mulf %161, %166 : vector<16x32xf32>
    %c0_47 = arith.constant 0 : index
    %c0_48 = arith.constant 0 : index
    %168 = vector.load %arg4[%c0_47, %c0_48] : memref<144x80xf32, #tpu.memory_space<vmem>>, vector<144x80xf32>
    %169 = tpu.concatenate %146, %167 in 0 : vector<64x32xf32>, vector<16x32xf32> -> vector<80x32xf32>
    %cst_49 = arith.constant dense<0.000000e+00> : vector<144x32xf32>
    %170 = tpu.matmul %168, %169, %cst_49 {dimension_numbers = #tpu.dot_dimension_numbers<[1], [0], [0], [1], [0, 0, 1, 1], [], []>} : vector<144x80xf32>, vector<80x32xf32>, vector<144x32xf32> -> vector<144x32xf32>
    %171 = vector.extract_strided_slice %170 {offsets = [0, 0], sizes = [16, 32], strides = [1, 1]} : vector<144x32xf32> to vector<16x32xf32>
    %172 = vector.extract_strided_slice %170 {offsets = [16, 0], sizes = [64, 32], strides = [1, 1]} : vector<144x32xf32> to vector<64x32xf32>
    %173 = vector.extract_strided_slice %170 {offsets = [80, 0], sizes = [64, 32], strides = [1, 1]} : vector<144x32xf32> to vector<64x32xf32>
    %174 = tpu.concatenate %167, %171 in 1 : vector<16x32xf32>, vector<16x32xf32> -> vector<16x64xf32>
    %c168 = arith.constant 168 : index
    %c0_50 = arith.constant 0 : index
    %175 = vector.load %arg2[%c168, %c0_50] : memref<375x32xf32, #tpu.memory_space<vmem>>, vector<64x32xf32>
    %cst_51 = arith.constant dense<0.000000e+00> : vector<16x32xf32>
    %176 = tpu.matmul %174, %175, %cst_51 {dimension_numbers = #tpu.dot_dimension_numbers<[1], [0], [0], [1], [0, 0, 1, 1], [], []>} : vector<16x64xf32>, vector<64x32xf32>, vector<16x32xf32> -> vector<16x32xf32>
    %177 = vector.extract_strided_slice %0 {offsets = [8, 0], sizes = [1, 32], strides = [1, 1]} : vector<15x32xf32> to vector<1x32xf32>
    %178 = vector.broadcast %177 : vector<1x32xf32> to vector<16x32xf32>
    %179 = arith.addf %176, %178 : vector<16x32xf32>
    %180 = tpu.concatenate %146, %173, %172, %4 in 1 : vector<64x32xf32>, vector<64x32xf32>, vector<64x32xf32>, vector<64x32xf32> -> vector<64x128xf32>
    %c192 = arith.constant 192 : index
    %c0_52 = arith.constant 0 : index
    %181 = vector.load %arg3[%c192, %c0_52] : memref<326x64xf32, #tpu.memory_space<vmem>>, vector<128x64xf32>
    %cst_53 = arith.constant dense<0.000000e+00> : vector<64x64xf32>
    %182 = tpu.matmul %180, %181, %cst_53 {dimension_numbers = #tpu.dot_dimension_numbers<[1], [0], [0], [1], [0, 0, 1, 1], [], []>} : vector<64x128xf32>, vector<128x64xf32>, vector<64x64xf32> -> vector<64x64xf32>
    %183 = vector.extract_strided_slice %1 {offsets = [1, 0], sizes = [1, 64], strides = [1, 1]} : vector<6x64xf32> to vector<1x64xf32>
    %184 = vector.broadcast %183 : vector<1x64xf32> to vector<64x64xf32>
    %185 = arith.addf %182, %184 : vector<64x64xf32>
    %186 = tpu.concatenate %179, %5 in 1 : vector<16x32xf32>, vector<16x32xf32> -> vector<16x64xf32>
    %187 = arith.mulf %185, %185 : vector<64x64xf32>
    %188 = arith.mulf %186, %186 : vector<16x64xf32>
    %189 = tpu.concatenate %185, %186, %187, %188 in 0 : vector<64x64xf32>, vector<16x64xf32>, vector<64x64xf32>, vector<16x64xf32> -> vector<160x64xf32>
    %cst_54 = arith.constant dense<0.000000e+00> : vector<160x64xf32>
    %190 = tpu.matmul %189, %3, %cst_54 {dimension_numbers = #tpu.dot_dimension_numbers<[1], [0], [0], [1], [0, 0, 1, 1], [], []>} : vector<160x64xf32>, vector<64x64xf32>, vector<160x64xf32> -> vector<160x64xf32>
    %191 = vector.extract_strided_slice %190 {offsets = [64, 0], sizes = [16, 32], strides = [1, 1]} : vector<160x64xf32> to vector<16x32xf32>
    %192 = vector.extract_strided_slice %190 {offsets = [144, 0], sizes = [16, 32], strides = [1, 1]} : vector<160x64xf32> to vector<16x32xf32>
    %193 = arith.subf %179, %191 : vector<16x32xf32>
    %194 = arith.mulf %191, %191 : vector<16x32xf32>
    %195 = arith.subf %192, %194 : vector<16x32xf32>
    %cst_55 = arith.constant 9.99999974E-6 : f32
    %196 = vector.broadcast %cst_55 : f32 to vector<16x32xf32>
    %197 = arith.addf %195, %196 : vector<16x32xf32>
    %198 = math.rsqrt %197 : vector<16x32xf32>
    %199 = arith.mulf %193, %198 : vector<16x32xf32>
    %200 = vector.extract_strided_slice %0 {offsets = [10, 0], sizes = [1, 32], strides = [1, 1]} : vector<15x32xf32> to vector<1x32xf32>
    %201 = vector.broadcast %200 : vector<1x32xf32> to vector<16x32xf32>
    %202 = arith.mulf %199, %201 : vector<16x32xf32>
    %203 = vector.extract_strided_slice %0 {offsets = [12, 0], sizes = [1, 32], strides = [1, 1]} : vector<15x32xf32> to vector<1x32xf32>
    %204 = vector.broadcast %203 : vector<1x32xf32> to vector<16x32xf32>
    %205 = arith.addf %202, %204 : vector<16x32xf32>
    %cst_56 = arith.constant 5.000000e-01 : f32
    %206 = vector.broadcast %cst_56 : f32 to vector<16x32xf32>
    %207 = arith.mulf %206, %205 : vector<16x32xf32>
    %cst_57 = arith.constant 0.707106769 : f32
    %208 = vector.broadcast %cst_57 : f32 to vector<16x32xf32>
    %209 = arith.mulf %205, %208 : vector<16x32xf32>
    %210 = math.erf %209 : vector<16x32xf32>
    %cst_58 = arith.constant 1.000000e+00 : f32
    %211 = vector.broadcast %cst_58 : f32 to vector<16x32xf32>
    %212 = arith.addf %211, %210 : vector<16x32xf32>
    %213 = arith.mulf %207, %212 : vector<16x32xf32>
    %214 = tpu.concatenate %167, %213 in 1 : vector<16x32xf32>, vector<16x32xf32> -> vector<16x64xf32>
    %c0_59 = arith.constant 0 : index
    %c0_60 = arith.constant 0 : index
    %215 = vector.load %arg5[%c0_59, %c0_60] : memref<16x64xf32, #tpu.memory_space<vmem>>, vector<16x64xf32>
    tpu.vector_store %arg5[%c0_59, %c0_60], %214 {strides = array<i32>} : memref<16x64xf32, #tpu.memory_space<vmem>>, vector<16x64xf32>,
    return
  }
}

</mosaic_0001>

<bundles_post_ra>
// kernel: tpu_custom_call.1
= control target key start
LH: loop header
LB: loop body
LE: loop exit
PB: predicated region body
PF: predicated region fallthrough
CT: control target
= control target key end

     0   :  { %s3700_s22 = smov 96   ;;  %vm92_vm0 = vcmask 1043456   ;;  %s4814_s0 = inlined_call_operand.vmem [shape: f32[64,32], index: 0, kind: input, shape index: {}]   ;;  %s4815_s1 = inlined_call_operand.vmem [shape: f32[16,36], index: 1, kind: input, shape index: {}]   ;;  %s4816_s2 = inlined_call_operand.vmem [shape: f32[375,32], index: 2, kind: input, shape index: {}]   ;;  %s4817_s3 = inlined_call_operand.vmem [shape: f32[326,64], index: 3, kind: input, shape index: {}]   ;;  %s4818_s4 = inlined_call_operand.vmem [shape: f32[144,80], index: 4, kind: input, shape index: {}]   ;;  %s4819_s5 = inlined_call_operand.hbm [shape: f32[16,64], index: 5, kind: output, shape index: {}]  }
   0x1   :  { %v3739_v0 = vld [vmem:[%s4815_s1] sm:$0xff]  ;;  %v198_v2 = vld [vmem:[%s4816_s2 + $0x28] sm:$0xff]  ;;  %v199_v3 = vld [vmem:[%s4816_s2 + $0x30] sm:$0xff] }
   0x2   :  { %v76_v1 = vld [vmem:[%s4816_s2 + $0x20] sm:$0xf]  ;;  %83 = vrot.lane.b32.xlu0 %v3739_v0, %s3700_s22  ;;  %v3754_v4 = vld [vmem:[%s4815_s1 + $0x8] sm:$0xff]  ;;  %v3366_v5 = vpack.c.bf16 %v199_v3, %v198_v2 }
   0x3   :  { %2952 = vmatprep.subr.msk.mxu1 %vm92_vm0, %v76_v1 }
   0x4   :  { %2953 = vmatpush3.msk.msra.mxu1 %vm92_vm0, %v76_v1 }
   0x5   :  { %10 = vsyncpa [#allocation3], 0  ;;  %3367 = vmatprep.subr.bf16.mxu1 %v3366_v5  ;;  %v36_v6 = vld [vmem:[%s4814_s0] sm:$0xff]  ;;  %vm87_vm2 = vcmask 31744   ;;  %v200_v9 = vld [vmem:[%s4816_s2 + $0x38] sm:$0xff]  ;;  %vm179_vm3 = vcmask 261120   ;;  %v77_v55 = vlaneseq }
   0x6   :  { %85 = vrot.lane.b32.xlu0 %v3754_v4, %s3700_s22  ;;  %v52_v7 = vmul.f32 0.01, %v36_v6  ;;  %vm44_vm1 = vcmp.ge.f32.partialorder %v36_v6, 0.0  ;;  %v201_v10 = vld [vmem:[%s4816_s2 + $0x40] sm:$0xff]  ;;  %vm206_vm4 = vcmask 523264   ;;  %v202_v15 = vld [vmem:[%s4816_s2 + $0x48] sm:$0xff] }
   0x7   :  { %v3370_v12 = vpack.c.bf16 %v201_v10, %v200_v9  ;;  %v203_v16 = vld [vmem:[%s4816_s2 + $0x50] sm:$0xff]  ;;  %v204_v18 = vld [vmem:[%s4816_s2 + $0x58] sm:$0xff]  ;;  %v205_v19 = vld [vmem:[%s4816_s2 + $0x60] sm:$0xff]  ;;  %v3827_v56 = vshrl.u32 %v77_v55, 7  ;;  %v72_v61 = vmul.f32 0.01, %v3739_v0 }
   0x8   :  { %v60_v11 = vsel %vm44_vm1, %v36_v6, %v52_v7  ;;  %v3374_v17 = vpack.c.bf16 %v203_v16, %v202_v15  ;;  %v37_v20 = vld [vmem:[%s4814_s0 + $0x8] sm:$0xff]  ;;  %v38_v21 = vld [vmem:[%s4814_s0 + $0x10] sm:$0xff]  ;;  %v3378_v22 = vpack.c.bf16 %v205_v19, %v204_v18  ;;  %v39_v25 = vld [vmem:[%s4814_s0 + $0x18] sm:$0xff]  ;;  %vm70_vm12 = vcmp.ge.f32.partialorder %v3739_v0, 0.0  ;;  %s3701_s14 = smov 32   ;;  %s3702_s30 = smov 64  }
   0x9   :  { %v180_v13 = vsel %vm179_vm3, %v60_v11, 0.0  ;;  %v53_v23 = vmul.f32 0.01, %v37_v20  ;;  %vm45_vm5 = vcmp.ge.f32.partialorder %v37_v20, 0.0  ;;  %v54_v24 = vmul.f32 0.01, %v38_v21 }
   0xa   :  { %vm46_vm6 = vcmp.ge.f32.partialorder %v38_v21, 0.0  ;;  %v40_v26 = vld [vmem:[%s4814_s0 + $0x20] sm:$0xff]  ;;  %v55_v28 = vmul.f32 0.01, %v39_v25  ;;  %vm47_vm7 = vcmp.ge.f32.partialorder %v39_v25, 0.0  ;;  %v41_v31 = vld [vmem:[%s4814_s0 + $0x28] sm:$0xff]  ;;  %v74_v6 = vsel %vm70_vm12, %v3739_v0, %v72_v61 }
   0xb   :  { %v61_v27 = vsel %vm45_vm5, %v37_v20, %v53_v23  ;;  %v62_v29 = vsel %vm46_vm6, %v38_v21, %v54_v24  ;;  %v56_v30 = vmul.f32 0.01, %v40_v26  ;;  %vm48_vm8 = vcmp.ge.f32.partialorder %v40_v26, 0.0  ;;  %v42_v32 = vld [vmem:[%s4814_s0 + $0x30] sm:$0xff]  ;;  %v43_v39 = vld [vmem:[%s4814_s0 + $0x38] sm:$0xff]  ;;  %v24_v49 = vld [vmem:[%s4816_s2] sm:$0xff] }
   0xc   :  { %v181_v33 = vsel %vm179_vm3, %v61_v27, 0.0  ;;  %v182_v34 = vsel %vm179_vm3, %v62_v29, 0.0  ;;  %v63_v35 = vsel %vm47_vm7, %v39_v25, %v55_v28  ;;  %v57_v36 = vmul.f32 0.01, %v41_v31  ;;  %v25_v50 = vld [vmem:[%s4816_s2 + $0x8] sm:$0xff]  ;;  %v26_v51 = vld [vmem:[%s4816_s2 + $0x10] sm:$0xff] }
   0xd   :  { %v64_v37 = vsel %vm48_vm8, %v40_v26, %v56_v30  ;;  %vm49_vm9 = vcmp.ge.f32.partialorder %v41_v31, 0.0  ;;  %v58_v38 = vmul.f32 0.01, %v42_v32  ;;  %vm50_vm10 = vcmp.ge.f32.partialorder %v42_v32, 0.0  ;;  %v27_v53 = vld [vmem:[%s4816_s2 + $0x18] sm:$0xff]  ;;  %v3835_v58 = vld [vmem:[%s4816_s2 + $0x168] sm:$0xff] }
   0xe   :  { %v183_v40 = vsel %vm179_vm3, %v63_v35, 0.0  ;;  %v184_v41 = vsel %vm179_vm3, %v64_v37, 0.0  ;;  %v65_v42 = vsel %vm49_vm9, %v41_v31, %v57_v36  ;;  %v59_v43 = vmul.f32 0.01, %v43_v39 }
   0xf   :  { %v66_v44 = vsel %vm50_vm10, %v42_v32, %v58_v38  ;;  %vm51_vm11 = vcmp.ge.f32.partialorder %v43_v39, 0.0  ;;  %v185_v45 = vsel %vm179_vm3, %v65_v42, 0.0  ;;  %v3382_v52 = vpack.c.bf16 %v25_v50, %v24_v49 }
  0x10   :  { %v186_v46 = vsel %vm179_vm3, %v66_v44, 0.0  ;;  %v67_v47 = vsel %vm51_vm11, %v43_v39, %v59_v43  ;;  %v3386_v54 = vpack.c.bf16 %v27_v53, %v26_v51  ;;  %v3830_v57 = vsub.s32 0, %v3827_v56 }
  0x11   :  { %v187_v48 = vsel %vm179_vm3, %v67_v47, 0.0  ;;  %3383 = vmatprep.subr.bf16.mxu0 %v3382_v52  ;;  %v73_v2 = vmul.f32 0.01, %v3754_v4  ;;  %vm71_vm15 = vcmp.ge.f32.partialorder %v3754_v4, 0.0  ;;  %v3846_v11 = vsub.s32 2, %v3827_v56 }
  0x12   :  { %3385 = vmatpush3.bf16.msra.mxu0 %v3382_v52  ;;  %v80_v59 = vrot.slane %v3835_v58, %v3830_v57  ;;  %vm769_vm0 = vcmask 654336   ;;  %vm1162_vm1 = vcmask 785408  }
  0x13   :  { %3387 = vmatprep.subr.bf16.mxu0 %v3386_v54  ;;  %v75_v9 = vsel %vm71_vm15, %v3754_v4, %v73_v2 }
  0x16   :  { %3389 = vmatpush3.bf16.msra.mxu0 %v3386_v54 }
  0x74   :  { %v84_v8 = vpop.permute.xlu0 %83 }
  0x75   :  { %2954 = vmatprep.mubr.msk.f32.mxu1 %vm87_vm2, %v84_v8 }
  0x78   :  { %v86_v14 = vpop.permute.xlu0 %85 }
  0x79   :  { %2955 = vmatmul.mubr.msk.f32.vlgmr.msra.gmra.mrb[0].mxu1 %vm87_vm2, %v86_v14 }
  0x7a   :  { %3369 = vmatpush3.bf16.msra.mxu1 %v3366_v5  ;;  %2973 = vmatprep.mubr.msk.f32.mxu1 %vm206_vm4, %v180_v13  ;;  %v355_v13 = vrot.slane %v3835_v58, %v3846_v11 }
  0x7b   :  { %3371 = vmatprep.subr.bf16.mxu1 %v3370_v12 }
  0x7e   :  { %3373 = vmatpush3.bf16.msra.mxu1 %v3370_v12 }
  0x7f   :  { %3375 = vmatprep.subr.bf16.mxu1 %v3374_v17 }
  0x82   :  { %3377 = vmatpush3.bf16.msra.mxu1 %v3374_v17 }
  0x83   :  { %3379 = vmatprep.subr.bf16.mxu1 %v3378_v22 }
  0x86   :  { %3381 = vmatpush3.bf16.msra.mxu1 %v3378_v22 }
  0x89   :  { %2974 = vmatmul.mubr.msk.f32.vlgmr.msra.gmra.mrb[2].mxu1 %vm206_vm4, %v181_v33 }
  0x8a   :  { %2976 = vmatprep.mubr.msk.f32.mxu1 %vm206_vm4, %v182_v34 }
  0x8d   :  { %2977 = vmatmul.mubr.msk.f32.gmra.mrb[4].mxu1 %vm206_vm4, %v183_v40 }
  0x8e   :  { %2979 = vmatprep.mubr.msk.f32.mxu1 %vm206_vm4, %v184_v41 }
  0x91   :  { %2980 = vmatmul.mubr.msk.f32.gmra.mrb[6].mxu1 %vm206_vm4, %v185_v45 }
  0x92   :  { %2982 = vmatprep.mubr.msk.f32.mxu1 %vm206_vm4, %v186_v46 }
  0x95   :  { %2983 = vmatmul.mubr.msk.f32.gmra.mrb[8].mxu1 %vm206_vm4, %v187_v48 }
 0x14c   :  { %v2956_v60 = vpop.f32.mrb[0].mxu1 }
 0x14d   :  { %v168_v62 = vadd.f32 %v2956_v60, %v80_v59  ;;  %v162_v63 = vpop.f32.mrb[1].mxu1 }
 0x14e   :  { %v163_v1 = vadd.f32 %v162_v63, %v80_v59 }
 0x14f   :  { %v174_v3 = vmul.f32 0.01, %v168_v62  ;;  %vm172_vm14 = vcmp.ge.f32.partialorder %v168_v62, 0.0 }
 0x150   :  { %v173_v5 = vmul.f32 0.01, %v163_v1  ;;  %vm171_vm13 = vcmp.ge.f32.partialorder %v163_v1, 0.0 }
 0x151   :  { %v176_v10 = vsel %vm172_vm14, %v168_v62, %v174_v3 }
 0x152   :  { %v175_v7 = vsel %vm171_vm13, %v163_v1, %v173_v5  ;;  %v178_v12 = vadd.f32 %v176_v10, %v75_v9 }
 0x153   :  { %v177_v8 = vadd.f32 %v175_v7, %v74_v6 }
 0x155   :  { %190 = vrot.lane.b32.xlu1 %v177_v8, %s3701_s14 }
 0x159   :  { %192 = vrot.lane.b32.xlu1 %v178_v12, %s3701_s14 }
 0x15c   :  { %v2975_v0 = vpop.f32.mrb[2].mxu1 }
 0x15d   :  { %v357_v14 = vadd.f32 %v2975_v0, %v355_v13  ;;  %v303_v15 = vpop.f32.mrb[3].mxu1 }
 0x15e   :  { %v356_v16 = vadd.f32 %v355_v13, %v303_v15 }
 0x15f   :  { %v373_v17 = vmul.f32 0.70710677, %v357_v14  ;;  %v365_v33 = vmul.f32 0.5, %v357_v14 }
 0x160   :  { %v372_v18 = vmul.f32 0.70710677, %v356_v16  ;;  %v2978_v4 = vpop.f32.mrb[4].mxu1  ;;  %v364_v36 = vmul.f32 0.5, %v356_v16 }
 0x161   :  { %3588 = verf.f32 %v373_v17  ;;  %v359_v19 = vadd.f32 %v2978_v4, %v355_v13  ;;  %v313_v20 = vpop.f32.mrb[5].mxu1 }
 0x162   :  { %3590 = verf.f32 %v372_v18  ;;  %v358_v21 = vadd.f32 %v355_v13, %v313_v20  ;;  %v3905_v20 = vsub.s32 1, %v3827_v56 }
 0x163   :  { %v375_v22 = vmul.f32 0.70710677, %v359_v19  ;;  %v367_v43 = vmul.f32 0.5, %v359_v19 }
 0x164   :  { %v374_v23 = vmul.f32 0.70710677, %v358_v21  ;;  %v2981_v24 = vpop.f32.mrb[6].mxu1  ;;  %v366_v45 = vmul.f32 0.5, %v358_v21  ;;  %v407_v21 = vrot.slane %v3835_v58, %v3905_v20 }
 0x165   :  { %3592 = verf.f32 %v375_v22  ;;  %v361_v25 = vadd.f32 %v2981_v24, %v355_v13  ;;  %v323_v26 = vpop.f32.mrb[7].mxu1 }
 0x166   :  { %3594 = verf.f32 %v374_v23  ;;  %v360_v27 = vadd.f32 %v355_v13, %v323_v26 }
 0x167   :  { %v377_v28 = vmul.f32 0.70710677, %v361_v25  ;;  %v369_v51 = vmul.f32 0.5, %v361_v25 }
 0x168   :  { %v376_v29 = vmul.f32 0.70710677, %v360_v27  ;;  %v2984_v30 = vpop.f32.mrb[8].mxu1  ;;  %v368_v54 = vmul.f32 0.5, %v360_v27 }
 0x169   :  { %3596 = verf.f32 %v377_v28  ;;  %v363_v31 = vadd.f32 %v2984_v30, %v355_v13  ;;  %v333_v32 = vpop.f32.mrb[9].mxu1 }
 0x16a   :  { %3598 = verf.f32 %v376_v29  ;;  %v362_v34 = vadd.f32 %v355_v13, %v333_v32 }
 0x16b   :  { %v3589_v35 = vpop.eup %3588  ;;  %v379_v37 = vmul.f32 0.70710677, %v363_v31  ;;  %v371_v62 = vmul.f32 0.5, %v363_v31 }
 0x16c   :  { %v3591_v38 = vpop.eup %3590  ;;  %v389_v39 = vadd.f32 1.0, %v3589_v35  ;;  %v378_v40 = vmul.f32 0.70710677, %v362_v34  ;;  %v370_v2 = vmul.f32 0.5, %v362_v34 }
 0x16d   :  { %v388_v41 = vadd.f32 1.0, %v3591_v38  ;;  %3600 = verf.f32 %v379_v37 }
 0x16e   :  { %v3852_v42 = vmul.f32 %v389_v39, %v365_v33  ;;  %3602 = verf.f32 %v378_v40 }
 0x16f   :  { %v3593_v44 = vpop.eup %3592  ;;  %v3854_v46 = vmul.f32 %v388_v41, %v364_v36 }
 0x170   :  { %v3595_v47 = vpop.eup %3594  ;;  %v391_v48 = vadd.f32 1.0, %v3593_v44  ;;  %v421_v37 = vmul.f32 %v3852_v42, %v3852_v42 }
 0x171   :  { %v390_v49 = vadd.f32 1.0, %v3595_v47  ;;  %2996 = vmatprep.mubr.msk.f32.mxu0 %vm179_vm3, %v3854_v46  ;;  %v420_v36 = vmul.f32 %v3854_v46, %v3854_v46 }
 0x172   :  { %v3858_v50 = vmul.f32 %v391_v48, %v367_v43  ;;  %2997 = vmatmul.mubr.msk.f32.vlgmr.msra.gmra.mrb[0].mxu0 %vm179_vm3, %v3852_v42  ;;  %v3950_v48 = vld [vmem:[%s4818_s4] sm:$0xff] }
 0x173   :  { %v3597_v52 = vpop.eup %3596  ;;  %v3862_v53 = vmul.f32 %v390_v49, %v366_v45 }
 0x174   :  { %v3599_v55 = vpop.eup %3598  ;;  %v393_v59 = vadd.f32 1.0, %v3597_v52  ;;  %v423_v39 = vmul.f32 %v3858_v50, %v3858_v50 }
 0x175   :  { %v392_v60 = vadd.f32 1.0, %v3599_v55  ;;  %2999 = vmatprep.mubr.msk.f32.mxu0 %vm179_vm3, %v3862_v53  ;;  %v422_v38 = vmul.f32 %v3862_v53, %v3862_v53 }
 0x176   :  { %v3866_v61 = vmul.f32 %v393_v59, %v369_v51  ;;  %3000 = vmatmul.mubr.msk.f32.gmra.mrb[2].mxu0 %vm179_vm3, %v3858_v50 }
 0x177   :  { %v3601_v63 = vpop.eup %3600  ;;  %v3870_v1 = vmul.f32 %v392_v60, %v368_v54 }
 0x178   :  { %v3603_v3 = vpop.eup %3602  ;;  %v395_v5 = vadd.f32 1.0, %v3601_v63  ;;  %v425_v41 = vmul.f32 %v3866_v61, %v3866_v61 }
 0x179   :  { %v394_v6 = vadd.f32 1.0, %v3603_v3  ;;  %3002 = vmatprep.mubr.msk.f32.mxu0 %vm179_vm3, %v3870_v1  ;;  %v424_v40 = vmul.f32 %v3870_v1, %v3870_v1 }
 0x17a   :  { %v3874_v7 = vmul.f32 %v395_v5, %v371_v62  ;;  %3003 = vmatmul.mubr.msk.f32.gmra.mrb[4].mxu0 %vm179_vm3, %v3866_v61 }
 0x17b   :  { %v3878_v8 = vmul.f32 %v394_v6, %v370_v2 }
 0x17c   :  { %v427_v44 = vmul.f32 %v3874_v7, %v3874_v7 }
 0x17d   :  { %3005 = vmatprep.mubr.msk.f32.mxu0 %vm179_vm3, %v3878_v8  ;;  %v426_v43 = vmul.f32 %v3878_v8, %v3878_v8 }
 0x17e   :  { %3006 = vmatmul.mubr.msk.f32.gmra.mrb[6].mxu0 %vm179_vm3, %v3874_v7 }
 0x1c7   :  { %v191_v9 = vpop.permute.xlu1 %190 }
 0x1c8   :  { %v196_v10 = vsel %vm179_vm3, 0.0, %v191_v9 }
 0x1c9   :  { %2985 = vmatprep.mubr.msk.f32.mxu1 %vm206_vm4, %v196_v10 }
 0x1cb   :  { %v193_v12 = vpop.permute.xlu1 %192 }
 0x1cc   :  { %v197_v13 = vsel %vm179_vm3, 0.0, %v193_v12 }
 0x1cd   :  { %2986 = vmatmul.mubr.msk.f32.gmra.mrb[10].mxu1 %vm206_vm4, %v197_v13 }
 0x1ce   :  { %3046 = vmatprep.mubr.msk.f32.mxu1 %vm769_vm0, %v3950_v48 }
 0x245   :  { %v3888_v0 = vpop.f32.mrb[0].mxu0 }
 0x246   :  { %v3890_v14 = vpop.f32.mrb[1].mxu0  ;;  %v664_v52 = vmul.f32 %v3888_v0, %v3888_v0 }
 0x247   :  { %v663_v54 = vmul.f32 %v3890_v14, %v3890_v14 }
 0x249   :  { %v3892_v15 = vpop.f32.mrb[2].mxu0 }
 0x24a   :  { %v3894_v16 = vpop.f32.mrb[3].mxu0  ;;  %v666_v63 = vmul.f32 %v3892_v15, %v3892_v15 }
 0x24b   :  { %v665_v3 = vmul.f32 %v3894_v16, %v3894_v16 }
 0x24d   :  { %v3896_v17 = vpop.f32.mrb[4].mxu0 }
 0x24e   :  { %v3898_v18 = vpop.f32.mrb[5].mxu0  ;;  %v668_v13 = vmul.f32 %v3896_v17, %v3896_v17 }
 0x251   :  { %v3900_v4 = vpop.f32.mrb[6].mxu0 }
 0x252   :  { %v3902_v19 = vpop.f32.mrb[7].mxu0 }
 0x2a0   :  { %v2987_v22 = vpop.f32.mrb[10].mxu1 }
 0x2a1   :  { %v409_v23 = vadd.f32 %v2987_v22, %v407_v21  ;;  %v343_v24 = vpop.f32.mrb[11].mxu1  ;;  %v667_v22 = vmul.f32 %v3898_v18, %v3898_v18 }
 0x2a2   :  { %v408_v25 = vadd.f32 %v407_v21, %v343_v24 }
 0x2a3   :  { %v413_v26 = vmul.f32 0.70710677, %v409_v23  ;;  %v411_v33 = vmul.f32 0.5, %v409_v23 }
 0x2a4   :  { %v412_v27 = vmul.f32 0.70710677, %v408_v25  ;;  %v410_v31 = vmul.f32 0.5, %v408_v25 }
 0x2a5   :  { %3604 = verf.f32 %v413_v26 }
 0x2a6   :  { %3606 = verf.f32 %v412_v27  ;;  %v3971_v27 = vsub.s32 4, %v3827_v56 }
 0x2a8   :  { %4823 = vst [vmem:[#allocation5_spill] sm:$0xff] %v3971_v27 }
 0x2af   :  { %v3605_v28 = vpop.eup %3604 }
 0x2b0   :  { %v3607_v29 = vpop.eup %3606  ;;  %v417_v30 = vadd.f32 1.0, %v3605_v28 }
 0x2b1   :  { %v416_v32 = vadd.f32 1.0, %v3607_v29  ;;  %v670_v29 = vmul.f32 %v3900_v4, %v3900_v4 }
 0x2b2   :  { %v3911_v35 = vmul.f32 %v417_v30, %v411_v33 }
 0x2b3   :  { %v3909_v34 = vmul.f32 %v416_v32, %v410_v31  ;;  %v717_v31 = vsub.s32 6, %v3827_v56  ;;  %v669_v32 = vmul.f32 %v3902_v19, %v3902_v19 }
 0x2b4   :  { %v429_v47 = vmul.f32 %v3911_v35, %v3911_v35 }
 0x2b5   :  { %3008 = vmatprep.mubr.msk.f32.mxu0 %vm179_vm3, %v3909_v34  ;;  %v428_v45 = vmul.f32 %v3909_v34, %v3909_v34 }
 0x2b6   :  { %3009 = vmatmul.mubr.msk.f32.gmra.mrb[8].mxu0 %vm179_vm3, %v3911_v35 }
 0x2b7   :  { %3011 = vmatprep.mubr.msk.f32.mxu0 %vm179_vm3, %v420_v36 }
 0x2ba   :  { %3012 = vmatmul.mubr.msk.f32.gmra.mrb[10].mxu0 %vm179_vm3, %v421_v37 }
 0x2bb   :  { %3014 = vmatprep.mubr.msk.f32.mxu0 %vm179_vm3, %v422_v38 }
 0x2be   :  { %3015 = vmatmul.mubr.msk.f32.gmra.mrb[12].mxu0 %vm179_vm3, %v423_v39  ;;  %v3980_v39 = vrot.slane %v3835_v58, %v3971_v27 }
 0x2bf   :  { %3017 = vmatprep.mubr.msk.f32.mxu0 %vm179_vm3, %v424_v40  ;;  %v656_v40 = vsub.f32 %v3852_v42, %v3888_v0 }
 0x2c2   :  { %3018 = vmatmul.mubr.msk.f32.gmra.mrb[14].mxu0 %vm179_vm3, %v425_v41 }
 0x2c3   :  { %3020 = vmatprep.mubr.msk.f32.mxu0 %vm179_vm3, %v426_v43 }
 0x2c6   :  { %3021 = vmatmul.mubr.msk.f32.gmra.mrb[16].mxu0 %vm179_vm3, %v427_v44  ;;  %v655_v44 = vsub.f32 %v3854_v46, %v3890_v14  ;;  %v658_v46 = vsub.f32 %v3858_v50, %v3892_v15 }
 0x2c7   :  { %3023 = vmatprep.mubr.msk.f32.mxu0 %vm179_vm3, %v428_v45 }
 0x2ca   :  { %3024 = vmatmul.mubr.msk.f32.gmra.mrb[18].mxu0 %vm179_vm3, %v429_v47 }
 0x389   :  { %v3954_v49 = vpop.f32.mrb[8].mxu0 }
 0x38a   :  { %v3956_v51 = vpop.f32.mrb[9].mxu0  ;;  %v730_v45 = vmul.f32 %v3954_v49, %v3954_v49 }
 0x38d   :  { %v3013_v55 = vpop.f32.mrb[10].mxu0 }
 0x38e   :  { %v672_v59 = vsub.f32 %v3013_v55, %v664_v52  ;;  %v606_v60 = vpop.f32.mrb[11].mxu0  ;;  %v729_v55 = vmul.f32 %v3956_v51, %v3956_v51 }
 0x38f   :  { %v671_v62 = vsub.f32 %v606_v60, %v663_v54  ;;  %v3989_v54 = vrot.slane %v3835_v58, %v717_v31 }
 0x390   :  { %v680_v2 = vadd.f32 1e-05, %v672_v59 }
 0x391   :  { %v679_v5 = vadd.f32 1e-05, %v671_v62  ;;  %v3016_v6 = vpop.f32.mrb[12].mxu0 }
 0x392   :  { %3608 = vrsqrt.f32 %v680_v2  ;;  %v674_v9 = vsub.f32 %v3016_v6, %v666_v63  ;;  %v616_v10 = vpop.f32.mrb[13].mxu0 }
 0x393   :  { %3610 = vrsqrt.f32 %v679_v5  ;;  %v673_v12 = vsub.f32 %v616_v10, %v665_v3  ;;  %v657_v5 = vsub.f32 %v3862_v53, %v3894_v16 }
 0x394   :  { %v682_v21 = vadd.f32 1e-05, %v674_v9 }
 0x395   :  { %v681_v23 = vadd.f32 1e-05, %v673_v12  ;;  %v3019_v24 = vpop.f32.mrb[14].mxu0 }
 0x396   :  { %3612 = vrsqrt.f32 %v682_v21  ;;  %v676_v25 = vsub.f32 %v3019_v24, %v668_v13  ;;  %v626_v26 = vpop.f32.mrb[15].mxu0 }
 0x397   :  { %3614 = vrsqrt.f32 %v681_v23  ;;  %v675_v28 = vsub.f32 %v626_v26, %v667_v22  ;;  %v660_v22 = vsub.f32 %v3866_v61, %v3896_v17  ;;  %v659_v23 = vsub.f32 %v3870_v1, %v3898_v18 }
 0x398   :  { %v684_v30 = vadd.f32 1e-05, %v676_v25  ;;  %v4821_v18 = vsub.s32 3, %v3827_v56 }
 0x399   :  { %v683_v33 = vadd.f32 1e-05, %v675_v28  ;;  %v3022_v36 = vpop.f32.mrb[16].mxu0 }
 0x39a   :  { %3616 = vrsqrt.f32 %v684_v30  ;;  %v678_v37 = vsub.f32 %v3022_v36, %v670_v29  ;;  %v636_v38 = vpop.f32.mrb[17].mxu0  ;;  %v662_v30 = vsub.f32 %v3874_v7, %v3900_v4  ;;  %v4820_v7 = vsub.s32 5, %v3827_v56 }
 0x39b   :  { %3618 = vrsqrt.f32 %v683_v33  ;;  %v677_v41 = vsub.f32 %v636_v38, %v669_v32  ;;  %v661_v32 = vsub.f32 %v3878_v8, %v3902_v19  ;;  %v728_v8 = vsub.f32 %v3911_v35, %v3954_v49 }
 0x39c   :  { %v3609_v43 = vpop.eup %3608  ;;  %v686_v47 = vadd.f32 1e-05, %v678_v37  ;;  %v748_v49 = vrot.slane %v3835_v58, %v4820_v7 }
 0x39d   :  { %v3611_v52 = vpop.eup %3610  ;;  %v685_v59 = vadd.f32 1e-05, %v677_v41  ;;  %v3025_v60 = vpop.f32.mrb[18].mxu0  ;;  %v696_v42 = vmul.f32 %v3609_v43, %v656_v40  ;;  %v742_v43 = vrot.slane %v3835_v58, %v4821_v18 }
 0x39e   :  { %3620 = vrsqrt.f32 %v686_v47  ;;  %v732_v0 = vsub.f32 %v3025_v60, %v730_v45  ;;  %v646_v62 = vpop.f32.mrb[19].mxu0  ;;  %v695_v63 = vmul.f32 %v3611_v52, %v655_v44  ;;  %v727_v45 = vsub.f32 %v3909_v34, %v3956_v51 }
 0x39f   :  { %3622 = vrsqrt.f32 %v685_v59  ;;  %v731_v14 = vsub.f32 %v646_v62, %v729_v55  ;;  %v708_v2 = vmul.f32 %v3980_v39, %v696_v42 }
 0x3a0   :  { %v3613_v3 = vpop.eup %3612  ;;  %v734_v6 = vadd.f32 1e-05, %v732_v0  ;;  %v707_v9 = vmul.f32 %v3980_v39, %v695_v63 }
 0x3a1   :  { %v3615_v10 = vpop.eup %3614  ;;  %v733_v12 = vadd.f32 1e-05, %v731_v14  ;;  %v4000_v13 = vadd.f32 %v3989_v54, %v708_v2  ;;  %v698_v21 = vmul.f32 %v3613_v3, %v658_v46  ;;  %v4071_v46 = vld [vmem:[%s4818_s4 + $0x10] sm:$0xff]  ;;  %v4080_v14 = vld [vmem:[%s4818_s4 + $0x18] sm:$0xff]  ;;  %v4085_v2 = vld [vmem:[%s4818_s4 + $0x20] sm:$0xff] }
 0x3a2   :  { %3624 = vrsqrt.f32 %v734_v6  ;;  %v4003_v50 = vadd.f32 %v3989_v54, %v707_v9  ;;  %v697_v15 = vmul.f32 %v3615_v10, %v657_v5  ;;  %v4094_v3 = vld [vmem:[%s4818_s4 + $0x28] sm:$0xff]  ;;  %v4099_v5 = vld [vmem:[%s4818_s4 + $0x30] sm:$0xff]  ;;  %v4108_v6 = vld [vmem:[%s4818_s4 + $0x38] sm:$0xff] }
 0x3a3   :  { %3626 = vrsqrt.f32 %v733_v12  ;;  %v710_v53 = vmul.f32 %v3980_v39, %v698_v21  ;;  %v4113_v9 = vld [vmem:[%s4818_s4 + $0x40] sm:$0xff]  ;;  %v4122_v10 = vld [vmem:[%s4818_s4 + $0x48] sm:$0xff]  ;;  %v4127_v12 = vld [vmem:[%s4818_s4 + $0x50] sm:$0xff] }
 0x3a4   :  { %v3617_v16 = vpop.eup %3616  ;;  %v3390_v24 = vpack.c.bf16 %v4000_v13, %v4003_v50  ;;  %v709_v25 = vmul.f32 %v3980_v39, %v697_v15  ;;  %v4136_v21 = vld [vmem:[%s4818_s4 + $0x58] sm:$0xff]  ;;  %v4141_v15 = vld [vmem:[%s4818_s4 + $0x60] sm:$0xff] }
 0x3a5   :  { %v3619_v26 = vpop.eup %3618  ;;  %v4014_v28 = vadd.f32 %v3989_v54, %v710_v53  ;;  %v700_v29 = vmul.f32 %v3617_v16, %v660_v22  ;;  %v4150_v22 = vld [vmem:[%s4818_s4 + $0x68] sm:$0xff]  ;;  %v4155_v53 = vld [vmem:[%s4818_s4 + $0x70] sm:$0xff]  ;;  %v4164_v16 = vld [vmem:[%s4818_s4 + $0x78] sm:$0xff] }
 0x3a6   :  { %3391 = vmatprep.subr.bf16.mxu1 %v3390_v24  ;;  %v4017_v61 = vadd.f32 %v3989_v54, %v709_v25  ;;  %v699_v17 = vmul.f32 %v3619_v26, %v659_v23  ;;  %v4169_v23 = vld [vmem:[%s4818_s4 + $0x80] sm:$0xff]  ;;  %v1172_v26 = vld [vmem:[%s4817_s3 + $0x48] sm:$0xff] }
 0x3a7   :  { %3393 = vmatpush3.bf16.msra.mxu1 %v3390_v24  ;;  %v712_v1 = vmul.f32 %v3980_v39, %v700_v29  ;;  %v4178_v24 = vld [vmem:[%s4818_s4 + $0x88] sm:$0xff]  ;;  %v1171_v25 = vld [vmem:[%s4817_s3 + $0x40] sm:$0xff]  ;;  %v1173_v29 = vld [vmem:[%s4817_s3 + $0x50] sm:$0xff] }
 0x3a8   :  { %v3621_v31 = vpop.eup %3620  ;;  %v3394_v33 = vpack.c.bf16 %v4014_v28, %v4017_v61  ;;  %v711_v36 = vmul.f32 %v3980_v39, %v699_v17  ;;  %v3426_v17 = vpack.c.bf16 %v1172_v26, %v1171_v25  ;;  %v1185_v25 = vld [vmem:[%s4817_s3 + $0xb0] sm:$0xff]  ;;  %v1186_v26 = vld [vmem:[%s4817_s3 + $0xb8] sm:$0xff] }
 0x3a9   :  { %v3623_v37 = vpop.eup %3622  ;;  %v4029_v38 = vadd.f32 %v3989_v54, %v712_v1  ;;  %v702_v40 = vmul.f32 %v3621_v31, %v662_v30  ;;  %v1174_v30 = vld [vmem:[%s4817_s3 + $0x58] sm:$0xff]  ;;  %v1175_v31 = vld [vmem:[%s4817_s3 + $0x60] sm:$0xff] }
 0x3aa   :  { %3395 = vmatprep.subr.bf16.mxu1 %v3394_v33  ;;  %v4033_v4 = vadd.f32 %v3989_v54, %v711_v36  ;;  %v701_v41 = vmul.f32 %v3623_v37, %v661_v32  ;;  %v3430_v1 = vpack.c.bf16 %v1174_v30, %v1173_v29  ;;  %v1176_v32 = vld [vmem:[%s4817_s3 + $0x68] sm:$0xff]  ;;  %v1177_v36 = vld [vmem:[%s4817_s3 + $0x70] sm:$0xff]  ;;  %v1178_v37 = vld [vmem:[%s4817_s3 + $0x78] sm:$0xff]  ;;  %v3454_v29 = vpack.c.bf16 %v1186_v26, %v1185_v25 }
 0x3ab   :  { %3397 = vmatpush3.bf16.msra.mxu1 %v3394_v33  ;;  %v714_v19 = vmul.f32 %v3980_v39, %v702_v40  ;;  %v3434_v33 = vpack.c.bf16 %v1176_v32, %v1175_v31  ;;  %v3438_v40 = vpack.c.bf16 %v1178_v37, %v1177_v36  ;;  %v991_v31 = vld [vmem:[%s4816_s2 + $0x78] sm:$0xff]  ;;  %v992_v32 = vld [vmem:[%s4816_s2 + $0x80] sm:$0xff] }
 0x3ac   :  { %v3625_v44 = vpop.eup %3624  ;;  %v3398_v47 = vpack.c.bf16 %v4029_v38, %v4033_v4  ;;  %v713_v52 = vmul.f32 %v3980_v39, %v701_v41  ;;  %v1179_v41 = vld [vmem:[%s4817_s3 + $0x80] sm:$0xff]  ;;  %v3414_v36 = vpack.c.bf16 %v992_v32, %v991_v31 }
 0x3ad   :  { %v3627_v55 = vpop.eup %3626  ;;  %v4047_v59 = vadd.f32 %v3989_v54, %v714_v19  ;;  %v738_v35 = vmul.f32 %v3625_v44, %v728_v8  ;;  %v1180_v8 = vld [vmem:[%s4817_s3 + $0x88] sm:$0xff]  ;;  %v1182_v44 = vld [vmem:[%s4817_s3 + $0x98] sm:$0xff] }
 0x3ae   :  { %3399 = vmatprep.subr.bf16.mxu1 %v3398_v47  ;;  %v4053_v60 = vadd.f32 %v3989_v54, %v713_v52  ;;  %v737_v42 = vmul.f32 %v3627_v55, %v727_v45  ;;  %v4066_v54 = vld [vmem:[%s4818_s4 + $0x8] sm:$0xff]  ;;  %v3442_v19 = vpack.c.bf16 %v1180_v8, %v1179_v41  ;;  %v1183_v55 = vld [vmem:[%s4817_s3 + $0xa0] sm:$0xff]  ;;  %v994_v41 = vld [vmem:[%s4816_s2 + $0x90] sm:$0xff] }
 0x3af   :  { %3401 = vmatpush3.bf16.msra.mxu1 %v3398_v47  ;;  %v744_v34 = vmul.f32 %v742_v43, %v738_v35  ;;  %v1184_v35 = vld [vmem:[%s4817_s3 + $0xa8] sm:$0xff] }
 0x3b0   :  { %v3402_v51 = vpack.c.bf16 %v4047_v59, %v4053_v60  ;;  %v743_v39 = vmul.f32 %v742_v43, %v737_v42  ;;  %v1181_v43 = vld [vmem:[%s4817_s3 + $0x90] sm:$0xff] }
 0x3b1   :  { %v4057_v0 = vadd.f32 %v748_v49, %v744_v34  ;;  %v3446_v45 = vpack.c.bf16 %v1182_v44, %v1181_v43  ;;  %v989_v34 = vld [vmem:[%s4816_s2 + $0x68] sm:$0xff]  ;;  %v995_v44 = vld [vmem:[%s4816_s2 + $0x98] sm:$0xff] }
 0x3b2   :  { %3403 = vmatprep.subr.bf16.mxu1 %v3402_v51  ;;  %v4059_v62 = vadd.f32 %v748_v49, %v743_v39  ;;  %v3450_v49 = vpack.c.bf16 %v1184_v35, %v1183_v55 }
 0x3b3   :  { %3405 = vmatpush3.bf16.msra.mxu1 %v3402_v51  ;;  %v990_v51 = vld [vmem:[%s4816_s2 + $0x70] sm:$0xff] }
 0x3b4   :  { %v3406_v63 = vpack.c.bf16 %v4057_v0, %v4059_v62 }
 0x3b6   :  { %3407 = vmatprep.subr.bf16.mxu1 %v3406_v63 }
 0x3b7   :  { %3409 = vmatpush3.bf16.msra.mxu1 %v3406_v63  ;;  %v3410_v63 = vpack.c.bf16 %v990_v51, %v989_v34  ;;  %v28_v34 = vld [vmem:[%s4817_s3] sm:$0xff]  ;;  %v29_v51 = vld [vmem:[%s4817_s3 + $0x8] sm:$0xff] }
 0x3b8   :  { %3427 = vmatprep.subr.bf16.mxu1 %v3426_v17 }
 0x3b9   :  { %3411 = vmatprep.subr.bf16.mxu0 %v3410_v63 }
 0x3ba   :  { %3047 = vmatmul.mubr.msk.f32.vlgmr.msra.gmra.mrb[12].mxu1 %vm769_vm0, %v4066_v54  ;;  %3413 = vmatpush3.bf16.msra.mxu0 %v3410_v63  ;;  %v4276_v63 = vpack.c.bf16 %v29_v51, %v28_v34 }
 0x3bb   :  { %3049 = vmatprep.mubr.msk.f32.mxu1 %vm769_vm0, %v4071_v46  ;;  %3429 = vmatpush3.bf16.msra.mxu1 %v3426_v17 }
 0x3bc   :  { %3431 = vmatprep.subr.bf16.mxu1 %v3430_v1  ;;  %3415 = vmatprep.subr.bf16.mxu0 %v3414_v36 }
 0x3be   :  { %3050 = vmatmul.mubr.msk.f32.gmra.mrb[14].mxu1 %vm769_vm0, %v4080_v14  ;;  %3417 = vmatpush3.bf16.msra.mxu0 %v3414_v36 }
 0x3bf   :  { %3052 = vmatprep.mubr.msk.f32.mxu1 %vm769_vm0, %v4085_v2  ;;  %3433 = vmatpush3.bf16.msra.mxu1 %v3430_v1 }
 0x3c0   :  { %3435 = vmatprep.subr.bf16.mxu1 %v3434_v33 }
 0x3c2   :  { %3053 = vmatmul.mubr.msk.f32.gmra.mrb[16].mxu1 %vm769_vm0, %v4094_v3 }
 0x3c3   :  { %3055 = vmatprep.mubr.msk.f32.mxu1 %vm769_vm0, %v4099_v5  ;;  %3437 = vmatpush3.bf16.msra.mxu1 %v3434_v33 }
 0x3c4   :  { %3439 = vmatprep.subr.bf16.mxu1 %v3438_v40 }
 0x3c6   :  { %3056 = vmatmul.mubr.msk.f32.gmra.mrb[18].mxu1 %vm769_vm0, %v4108_v6 }
 0x3c7   :  { %3058 = vmatprep.mubr.msk.f32.mxu1 %vm769_vm0, %v4113_v9  ;;  %3441 = vmatpush3.bf16.msra.mxu1 %v3438_v40  ;;  %v993_v40 = vld [vmem:[%s4816_s2 + $0x88] sm:$0xff] }
 0x3c8   :  { %3443 = vmatprep.subr.bf16.mxu1 %v3442_v19 }
 0x3ca   :  { %3059 = vmatmul.mubr.msk.f32.gmra.mrb[20].mxu1 %vm769_vm0, %v4122_v10 }
 0x3cb   :  { %3061 = vmatprep.mubr.msk.f32.mxu1 %vm769_vm0, %v4127_v12  ;;  %3445 = vmatpush3.bf16.msra.mxu1 %v3442_v19  ;;  %v3418_v19 = vpack.c.bf16 %v994_v41, %v993_v40 }
 0x3cc   :  { %3447 = vmatprep.subr.bf16.mxu1 %v3446_v45 }
 0x3cd   :  { %3419 = vmatprep.subr.bf16.mxu0 %v3418_v19 }
 0x3ce   :  { %3062 = vmatmul.mubr.msk.f32.gmra.mrb[22].mxu1 %vm769_vm0, %v4136_v21  ;;  %3421 = vmatpush3.bf16.msra.mxu0 %v3418_v19 }
 0x3cf   :  { %3064 = vmatprep.mubr.msk.f32.mxu1 %vm769_vm0, %v4141_v15  ;;  %3449 = vmatpush3.bf16.msra.mxu1 %v3446_v45  ;;  %v996_v45 = vld [vmem:[%s4816_s2 + $0xa0] sm:$0xff] }
 0x3d0   :  { %3451 = vmatprep.subr.bf16.mxu1 %v3450_v49  ;;  %v3422_v35 = vpack.c.bf16 %v996_v45, %v995_v44 }
 0x3d2   :  { %3065 = vmatmul.mubr.msk.f32.gmra.mrb[24].mxu1 %vm769_vm0, %v4150_v22  ;;  %3423 = vmatprep.subr.bf16.mxu0 %v3422_v35 }
 0x3d3   :  { %3067 = vmatprep.mubr.msk.f32.mxu1 %vm769_vm0, %v4155_v53  ;;  %3453 = vmatpush3.bf16.msra.mxu1 %v3450_v49 }
 0x3d4   :  { %3455 = vmatprep.subr.bf16.mxu1 %v3454_v29  ;;  %3425 = vmatpush3.bf16.msra.mxu0 %v3422_v35 }
 0x3d5   :  { %3459 = vmatprep.subr.bf16.mxu0 %v4276_v63 }
 0x3d6   :  { %3068 = vmatmul.mubr.msk.f32.gmra.mrb[26].mxu1 %vm769_vm0, %v4164_v16 }
 0x3d7   :  { %3070 = vmatprep.mubr.msk.f32.mxu1 %vm769_vm0, %v4169_v23  ;;  %3457 = vmatpush3.bf16.msra.mxu1 %v3454_v29 }
 0x3da   :  { %3071 = vmatmul.mubr.msk.f32.gmra.mrb[28].mxu1 %vm769_vm0, %v4178_v24 }
 0x48d   :  { %v4218_v47 = vpop.f32.mrb[12].mxu1 }
 0x48e   :  { %v4220_v52 = vpop.f32.mrb[13].mxu1 }
 0x491   :  { %v3051_v42 = vpop.f32.mrb[14].mxu1 }
 0x492   :  { %1124 = vrot.lane.b32.xlu1 %v3051_v42, %s3702_s30  ;;  %v900_v39 = vpop.f32.mrb[15].mxu1 }
 0x493   :  { %1122 = vrot.lane.b32.xlu0 %v900_v39, %s3702_s30 }
 0x495   :  { %v3054_v17 = vpop.f32.mrb[16].mxu1 }
 0x496   :  { %1128 = vrot.lane.b32.xlu1 %v3054_v17, %s3702_s30  ;;  %v910_v30 = vpop.f32.mrb[17].mxu1 }
 0x497   :  { %1126 = vrot.lane.b32.xlu0 %v910_v30, %s3702_s30 }
 0x499   :  { %v3057_v1 = vpop.f32.mrb[18].mxu1 }
 0x49a   :  { %1132 = vrot.lane.b32.xlu1 %v3057_v1, %s3702_s30  ;;  %v920_v33 = vpop.f32.mrb[19].mxu1 }
 0x49b   :  { %1130 = vrot.lane.b32.xlu0 %v920_v33, %s3702_s30 }
 0x49d   :  { %v3060_v37 = vpop.f32.mrb[20].mxu1 }
 0x49e   :  { %1136 = vrot.lane.b32.xlu1 %v3060_v37, %s3702_s30  ;;  %v930_v8 = vpop.f32.mrb[21].mxu1 }
 0x49f   :  { %1134 = vrot.lane.b32.xlu0 %v930_v8, %s3702_s30 }
 0x4a1   :  { %v3063_v43 = vpop.f32.mrb[22].mxu1 }
 0x4a2   :  { %1092 = vrot.lane.b32.xlu1 %v3063_v43, %s3701_s14  ;;  %v940_v55 = vpop.f32.mrb[23].mxu1 }
 0x4a3   :  { %1090 = vrot.lane.b32.xlu0 %v940_v55, %s3701_s14 }
 0x4a5   :  { %v3066_v49 = vpop.f32.mrb[24].mxu1 }
 0x4a6   :  { %1096 = vrot.lane.b32.xlu1 %v3066_v49, %s3701_s14  ;;  %v950_v42 = vpop.f32.mrb[25].mxu1 }
 0x4a7   :  { %1094 = vrot.lane.b32.xlu0 %v950_v42, %s3701_s14 }
 0x4a9   :  { %v3069_v39 = vpop.f32.mrb[26].mxu1 }
 0x4aa   :  { %1100 = vrot.lane.b32.xlu1 %v3069_v39, %s3701_s14  ;;  %v960_v25 = vpop.f32.mrb[27].mxu1 }
 0x4ab   :  { %1098 = vrot.lane.b32.xlu0 %v960_v25, %s3701_s14 }
 0x4ad   :  { %v3072_v26 = vpop.f32.mrb[28].mxu1 }
 0x4ae   :  { %1104 = vrot.lane.b32.xlu1 %v3072_v26, %s3701_s14  ;;  %v970_v29 = vpop.f32.mrb[29].mxu1 }
 0x4af   :  { %1102 = vrot.lane.b32.xlu0 %v970_v29, %s3701_s14  ;;  %v31_v29 = vld [vmem:[%s4817_s3 + $0x18] sm:$0xff] }
 0x4b2   :  { %983 = vrot.lane.b32.xlu1 %v4218_v47, %s3701_s14 }
 0x4b3   :  { %981 = vrot.lane.b32.xlu0 %v4220_v52, %s3701_s14 }
 0x504   :  { %v1125_v17 = vpop.permute.xlu1 %1124 }
 0x505   :  { %v1123_v30 = vpop.permute.xlu0 %1122 }
 0x508   :  { %v1129_v1 = vpop.permute.xlu1 %1128 }
 0x509   :  { %v1127_v31 = vpop.permute.xlu0 %1126 }
 0x50c   :  { %v1133_v32 = vpop.permute.xlu1 %1132 }
 0x50d   :  { %v1131_v33 = vpop.permute.xlu0 %1130 }
 0x510   :  { %v1137_v36 = vpop.permute.xlu1 %1136 }
 0x511   :  { %v1135_v37 = vpop.permute.xlu0 %1134 }
 0x514   :  { %v1093_v40 = vpop.permute.xlu1 %1092 }
 0x515   :  { %v1147_v41 = vsel %vm179_vm3, %v4000_v13, %v1093_v40  ;;  %v1091_v8 = vpop.permute.xlu0 %1090  ;;  %v4359_v40 = vld [vmem:[%s4817_s3 + $0x140] sm:$0x3f] }
 0x516   :  { %v1146_v47 = vsel %vm179_vm3, %v4003_v50, %v1091_v8  ;;  %v1155_v52 = vsel %vm206_vm4, %v1147_v41, %v1125_v17  ;;  %v1190_v41 = vrot.slane %v4359_v40, %v3830_v57  ;;  %v1596_v18 = vrot.slane %v4359_v40, %v3971_v27 }
 0x517   :  { %v1154_v19 = vsel %vm206_vm4, %v1146_v47, %v1123_v30 }
 0x518   :  { %3124 = vmatprep.mubr.msk.f32.mxu1 %vm1162_vm1, %v1154_v19  ;;  %v1097_v43 = vpop.permute.xlu1 %1096 }
 0x519   :  { %v1149_v44 = vsel %vm179_vm3, %v4014_v28, %v1097_v43  ;;  %3125 = vmatmul.mubr.msk.f32.vlgmr.msra.gmra.mrb[30].mxu1 %vm1162_vm1, %v1155_v52  ;;  %v1095_v45 = vpop.permute.xlu0 %1094 }
 0x51a   :  { %v1148_v13 = vsel %vm179_vm3, %v4017_v61, %v1095_v45  ;;  %v1157_v35 = vsel %vm206_vm4, %v1149_v44, %v1129_v1 }
 0x51b   :  { %v1156_v55 = vsel %vm206_vm4, %v1148_v13, %v1127_v31 }
 0x51c   :  { %3127 = vmatprep.mubr.msk.f32.mxu1 %vm1162_vm1, %v1156_v55  ;;  %v1101_v50 = vpop.permute.xlu1 %1100 }
 0x51d   :  { %v1151_v49 = vsel %vm179_vm3, %v4029_v38, %v1101_v50  ;;  %3128 = vmatmul.mubr.msk.f32.gmra.mrb[32].mxu1 %vm1162_vm1, %v1157_v35  ;;  %v1099_v42 = vpop.permute.xlu0 %1098  ;;  %v999_v50 = vsub.s32 7, %v3827_v56 }
 0x51e   :  { %v1150_v28 = vsel %vm179_vm3, %v4033_v4, %v1099_v42  ;;  %v1159_v51 = vsel %vm206_vm4, %v1151_v49, %v1133_v32  ;;  %v30_v4 = vld [vmem:[%s4817_s3 + $0x10] sm:$0xff]  ;;  %v32_v32 = vld [vmem:[%s4817_s3 + $0x20] sm:$0xff] }
 0x51f   :  { %v1158_v34 = vsel %vm206_vm4, %v1150_v28, %v1131_v33  ;;  %v4327_v1 = vpack.c.bf16 %v31_v29, %v30_v4  ;;  %v33_v33 = vld [vmem:[%s4817_s3 + $0x28] sm:$0xff] }
 0x520   :  { %3130 = vmatprep.mubr.msk.f32.mxu1 %vm1162_vm1, %v1158_v34  ;;  %v1105_v61 = vpop.permute.xlu1 %1104  ;;  %v1000_v34 = vrot.slane %v3835_v58, %v999_v50  ;;  %v1609_v50 = vld [vmem:[%s4816_s2 + $0x108] sm:$0xff] }
 0x521   :  { %v1153_v39 = vsel %vm179_vm3, %v4047_v59, %v1105_v61  ;;  %3131 = vmatmul.mubr.msk.f32.gmra.mrb[34].mxu1 %vm1162_vm1, %v1159_v51  ;;  %v1103_v25 = vpop.permute.xlu0 %1102 }
 0x522   :  { %v1152_v38 = vsel %vm179_vm3, %v4053_v60, %v1103_v25  ;;  %v1161_v59 = vsel %vm206_vm4, %v1153_v39, %v1137_v36  ;;  %v35_v36 = vld [vmem:[%s4817_s3 + $0x38] sm:$0xff] }
 0x523   :  { %v1160_v26 = vsel %vm206_vm4, %v1152_v38, %v1135_v37 }
 0x524   :  { %v984_v17 = vpop.permute.xlu1 %983  ;;  %3133 = vmatprep.mubr.msk.f32.mxu1 %vm1162_vm1, %v1160_v26 }
 0x525   :  { %3134 = vmatmul.mubr.msk.f32.gmra.mrb[36].mxu1 %vm1162_vm1, %v1161_v59  ;;  %v982_v30 = vpop.permute.xlu0 %981  ;;  %v988_v31 = vsel %vm179_vm3, %v4057_v0, %v984_v17  ;;  %v34_v0 = vld [vmem:[%s4817_s3 + $0x30] sm:$0xff] }
 0x526   :  { %v987_v60 = vsel %vm179_vm3, %v4059_v62, %v982_v30  ;;  %v4341_v62 = vpack.c.bf16 %v33_v33, %v32_v32  ;;  %v4352_v37 = vpack.c.bf16 %v35_v36, %v34_v0 }
 0x527   :  { %3089 = vmatprep.mubr.msk.f32.mxu0 %vm206_vm4, %v987_v60 }
 0x528   :  { %3090 = vmatmul.mubr.msk.f32.vlgmr.msra.gmra.mrb[20].mxu0 %vm206_vm4, %v988_v31 }
 0x529   :  { %3461 = vmatpush3.bf16.msra.mxu0 %v4276_v63 }
 0x52a   :  { %3463 = vmatprep.subr.bf16.mxu0 %v4327_v1 }
 0x52d   :  { %3465 = vmatpush3.bf16.msra.mxu0 %v4327_v1 }
 0x52e   :  { %3467 = vmatprep.subr.bf16.mxu0 %v4341_v62 }
 0x531   :  { %3469 = vmatpush3.bf16.msra.mxu0 %v4341_v62 }
 0x532   :  { %3471 = vmatprep.subr.bf16.mxu0 %v4352_v37 }
 0x535   :  { %3473 = vmatpush3.bf16.msra.mxu0 %v4352_v37 }
 0x5ec   :  { %v3126_v8 = vpop.f32.mrb[30].mxu1 }
 0x5ed   :  { %v1257_v47 = vpop.f32.mrb[31].mxu1  ;;  %v4365_v52 = vadd.f32 %v3126_v8, %v1190_v41  ;;  %v1605_v8 = vld [vmem:[%s4816_s2 + $0xe8] sm:$0xff] }
 0x5ee   :  { %v4363_v19 = vadd.f32 %v1257_v47, %v1190_v41  ;;  %v1606_v47 = vld [vmem:[%s4816_s2 + $0xf0] sm:$0xff] }
 0x5ef   :  { %v1299_v59 = vmul.f32 %v4365_v52, %v4365_v52 }
 0x5f0   :  { %v3129_v43 = vpop.f32.mrb[32].mxu1  ;;  %3152 = vmatprep.mubr.msk.f32.mxu0 %vm206_vm4, %v4363_v19  ;;  %v1298_v29 = vmul.f32 %v4363_v19, %v4363_v19 }
 0x5f1   :  { %v1267_v44 = vpop.f32.mrb[33].mxu1  ;;  %3153 = vmatmul.mubr.msk.f32.vlgmr.msra.gmra.mrb[22].mxu0 %vm206_vm4, %v4365_v52  ;;  %v4373_v13 = vadd.f32 %v3129_v43, %v1190_v41  ;;  %v3474_v43 = vpack.c.bf16 %v1606_v47, %v1605_v8 }
 0x5f2   :  { %v4371_v45 = vadd.f32 %v1267_v44, %v1190_v41  ;;  %v1607_v44 = vld [vmem:[%s4816_s2 + $0xf8] sm:$0xff] }
 0x5f3   :  { %v1301_v60 = vmul.f32 %v4373_v13, %v4373_v13  ;;  %3475 = vmatprep.subr.bf16.mxu1 %v3474_v43 }
 0x5f4   :  { %v3132_v55 = vpop.f32.mrb[34].mxu1  ;;  %3155 = vmatprep.mubr.msk.f32.mxu0 %vm206_vm4, %v4371_v45  ;;  %v1300_v30 = vmul.f32 %v4371_v45, %v4371_v45  ;;  %3477 = vmatpush3.bf16.msra.mxu1 %v3474_v43 }
 0x5f5   :  { %v1277_v35 = vpop.f32.mrb[35].mxu1  ;;  %3156 = vmatmul.mubr.msk.f32.gmra.mrb[24].mxu0 %vm206_vm4, %v4373_v13  ;;  %v4382_v42 = vadd.f32 %v3132_v55, %v1190_v41  ;;  %v1608_v55 = vld [vmem:[%s4816_s2 + $0x100] sm:$0xff] }
 0x5f6   :  { %v4380_v49 = vadd.f32 %v1277_v35, %v1190_v41  ;;  %v1610_v35 = vld [vmem:[%s4816_s2 + $0x110] sm:$0xff] }
 0x5f7   :  { %v1303_v32 = vmul.f32 %v4382_v42, %v4382_v42 }
 0x5f8   :  { %v3135_v28 = vpop.f32.mrb[36].mxu1  ;;  %3158 = vmatprep.mubr.msk.f32.mxu0 %vm206_vm4, %v4380_v49  ;;  %v1302_v31 = vmul.f32 %v4380_v49, %v4380_v49 }
 0x5f9   :  { %v1287_v61 = vpop.f32.mrb[37].mxu1  ;;  %3159 = vmatmul.mubr.msk.f32.gmra.mrb[26].mxu0 %vm206_vm4, %v4382_v42  ;;  %v4391_v39 = vadd.f32 %v3135_v28, %v1190_v41  ;;  %v3482_v28 = vpack.c.bf16 %v1610_v35, %v1609_v50 }
 0x5fa   :  { %v4389_v51 = vadd.f32 %v1287_v61, %v1190_v41  ;;  %v1612_v61 = vld [vmem:[%s4816_s2 + $0x120] sm:$0xff] }
 0x5fb   :  { %v3091_v25 = vpop.f32.mrb[20].mxu0  ;;  %v1305_v0 = vmul.f32 %v4391_v39, %v4391_v39 }
 0x5fc   :  { %v4393_v38 = vadd.f32 %v3091_v25, %v1000_v34  ;;  %v1073_v26 = vpop.f32.mrb[21].mxu0  ;;  %3161 = vmatprep.mubr.msk.f32.mxu0 %vm206_vm4, %v4389_v51  ;;  %v1304_v33 = vmul.f32 %v4389_v51, %v4389_v51 }
 0x5fd   :  { %v4397_v4 = vadd.f32 %v1073_v26, %v1000_v34  ;;  %3162 = vmatmul.mubr.msk.f32.gmra.mrb[28].mxu0 %vm206_vm4, %v4391_v39  ;;  %v1611_v34 = vld [vmem:[%s4816_s2 + $0x118] sm:$0xff] }
 0x5fe   :  { %v1297_v17 = vsel %vm179_vm3, %v4393_v38, 0.0  ;;  %v3486_v25 = vpack.c.bf16 %v1612_v61, %v1611_v34 }
 0x5ff   :  { %v1296_v58 = vsel %vm179_vm3, %v4397_v4, 0.0  ;;  %v1307_v41 = vmul.f32 %v1297_v17, %v1297_v17 }
 0x600   :  { %3164 = vmatprep.mubr.msk.f32.mxu0 %vm206_vm4, %v1296_v58  ;;  %v1306_v36 = vmul.f32 %v1296_v58, %v1296_v58 }
 0x601   :  { %3165 = vmatmul.mubr.msk.f32.gmra.mrb[30].mxu0 %vm206_vm4, %v1297_v17 }
 0x602   :  { %3167 = vmatprep.mubr.msk.f32.mxu0 %vm206_vm4, %v1298_v29 }
 0x605   :  { %3168 = vmatmul.mubr.msk.f32.gmra.mrb[32].mxu0 %vm206_vm4, %v1299_v59 }
 0x606   :  { %3170 = vmatprep.mubr.msk.f32.mxu0 %vm206_vm4, %v1300_v30 }
 0x609   :  { %3171 = vmatmul.mubr.msk.f32.gmra.mrb[34].mxu0 %vm206_vm4, %v1301_v60 }
 0x60a   :  { %3173 = vmatprep.mubr.msk.f32.mxu0 %vm206_vm4, %v1302_v31 }
 0x60d   :  { %3174 = vmatmul.mubr.msk.f32.gmra.mrb[36].mxu0 %vm206_vm4, %v1303_v32 }
 0x60e   :  { %3176 = vmatprep.mubr.msk.f32.mxu0 %vm206_vm4, %v1304_v33 }
 0x611   :  { %3177 = vmatmul.mubr.msk.f32.gmra.mrb[38].mxu0 %vm206_vm4, %v1305_v0 }
 0x612   :  { %3179 = vmatprep.mubr.msk.f32.mxu0 %vm206_vm4, %v1306_v36 }
 0x615   :  { %3180 = vmatmul.mubr.msk.f32.gmra.mrb[40].mxu0 %vm206_vm4, %v1307_v41 }
 0x616   :  { %3230 = vmatprep.mubr.msk.f32.mxu0 %vm769_vm0, %v3950_v48  ;;  %v3478_v48 = vpack.c.bf16 %v1608_v55, %v1607_v44 }
 0x618   :  { %3479 = vmatprep.subr.bf16.mxu1 %v3478_v48 }
 0x619   :  { %3481 = vmatpush3.bf16.msra.mxu1 %v3478_v48 }
 0x61a   :  { %3483 = vmatprep.subr.bf16.mxu1 %v3482_v28 }
 0x61d   :  { %3485 = vmatpush3.bf16.msra.mxu1 %v3482_v28 }
 0x61e   :  { %3487 = vmatprep.subr.bf16.mxu1 %v3486_v25 }
 0x621   :  { %3489 = vmatpush3.bf16.msra.mxu1 %v3486_v25 }
 0x6c4   :  { %v3154_v26 = vpop.f32.mrb[22].mxu0 }
 0x6c5   :  { %v1434_v58 = vpop.f32.mrb[23].mxu0  ;;  %v1542_v0 = vmul.f32 %v3154_v26, %v3154_v26 }
 0x6c6   :  { %v1541_v36 = vmul.f32 %v1434_v58, %v1434_v58 }
 0x6c8   :  { %v4459_v29 = vpop.f32.mrb[24].mxu0 }
 0x6c9   :  { %v4461_v17 = vpop.f32.mrb[25].mxu0  ;;  %v1544_v44 = vmul.f32 %v4459_v29, %v4459_v29 }
 0x6ca   :  { %v1543_v48 = vmul.f32 %v4461_v17, %v4461_v17 }
 0x6cc   :  { %v4463_v59 = vpop.f32.mrb[26].mxu0 }
 0x6cd   :  { %v4465_v30 = vpop.f32.mrb[27].mxu0  ;;  %v1546_v25 = vmul.f32 %v4463_v59, %v4463_v59 }
 0x6d0   :  { %v4467_v60 = vpop.f32.mrb[28].mxu0 }
 0x6d1   :  { %v4469_v31 = vpop.f32.mrb[29].mxu0 }
 0x6d4   :  { %v4471_v32 = vpop.f32.mrb[30].mxu0 }
 0x6d5   :  { %v4473_v33 = vpop.f32.mrb[31].mxu0 }
 0x6d8   :  { %v3169_v41 = vpop.f32.mrb[32].mxu0 }
 0x6d9   :  { %v1550_v8 = vsub.f32 %v3169_v41, %v1542_v0  ;;  %v1484_v47 = vpop.f32.mrb[33].mxu0 }
 0x6da   :  { %v1549_v43 = vsub.f32 %v1484_v47, %v1541_v36  ;;  %v1545_v36 = vmul.f32 %v4465_v30, %v4465_v30 }
 0x6db   :  { %v1558_v55 = vadd.f32 1e-05, %v1550_v8 }
 0x6dc   :  { %v1557_v50 = vadd.f32 1e-05, %v1549_v43  ;;  %v3172_v35 = vpop.f32.mrb[34].mxu0 }
 0x6dd   :  { %3628 = vrsqrt.f32 %v1558_v55  ;;  %v1552_v28 = vsub.f32 %v3172_v35, %v1544_v44  ;;  %v1494_v34 = vpop.f32.mrb[35].mxu0  ;;  %v1548_v44 = vmul.f32 %v4467_v60, %v4467_v60 }
 0x6de   :  { %3630 = vrsqrt.f32 %v1557_v50  ;;  %v1551_v61 = vsub.f32 %v1494_v34, %v1543_v48  ;;  %v1547_v48 = vmul.f32 %v4469_v31, %v4469_v31 }
 0x6df   :  { %v1560_v0 = vadd.f32 1e-05, %v1552_v28 }
 0x6e0   :  { %v1559_v41 = vadd.f32 1e-05, %v1551_v61  ;;  %v3175_v47 = vpop.f32.mrb[36].mxu0  ;;  %v4489_v61 = vrot.slane %v4359_v40, %v3846_v11 }
 0x6e1   :  { %3632 = vrsqrt.f32 %v1560_v0  ;;  %v1554_v8 = vsub.f32 %v3175_v47, %v1546_v25  ;;  %v1504_v7 = vpop.f32.mrb[37].mxu0  ;;  %v1534_v25 = vsub.f32 %v4365_v52, %v3154_v26 }
 0x6e2   :  { %3634 = vrsqrt.f32 %v1559_v41  ;;  %v1553_v43 = vsub.f32 %v1504_v7, %v1545_v36  ;;  %v1533_v36 = vsub.f32 %v4363_v19, %v1434_v58  ;;  %v1789_v41 = vmul.f32 %v4471_v32, %v4471_v32 }
 0x6e3   :  { %v1562_v55 = vadd.f32 1e-05, %v1554_v8  ;;  %v1536_v19 = vsub.f32 %v4373_v13, %v4459_v29  ;;  %v1538_v13 = vsub.f32 %v4382_v42, %v4463_v59  ;;  %v1540_v42 = vsub.f32 %v4391_v39, %v4467_v60 }
 0x6e4   :  { %v1561_v50 = vadd.f32 1e-05, %v1553_v43  ;;  %v3178_v35 = vpop.f32.mrb[38].mxu0  ;;  %v1788_v43 = vmul.f32 %v4473_v33, %v4473_v33 }
 0x6e5   :  { %3636 = vrsqrt.f32 %v1562_v55  ;;  %v1556_v28 = vsub.f32 %v3178_v35, %v1548_v44  ;;  %v1514_v34 = vpop.f32.mrb[39].mxu0 }
 0x6e6   :  { %3638 = vrsqrt.f32 %v1561_v50  ;;  %v1555_v7 = vsub.f32 %v1514_v34, %v1547_v48  ;;  %v1535_v34 = vsub.f32 %v4371_v45, %v4461_v17  ;;  %v1537_v45 = vsub.f32 %v4380_v49, %v4465_v30  ;;  %v4519_v49 = vld [vmem:[%s4816_s2 + $0x170] sm:$0x7f] }
 0x6e7   :  { %v3629_v0 = vpop.eup %3628  ;;  %v1564_v47 = vadd.f32 1e-05, %v1556_v28  ;;  %v1539_v30 = vsub.f32 %v4389_v51, %v4469_v31  ;;  %v1786_v31 = vsub.f32 %v4397_v4, %v4473_v33 }
 0x6e8   :  { %v3631_v8 = vpop.eup %3630  ;;  %v1574_v44 = vmul.f32 %v3629_v0, %v1534_v25  ;;  %v1563_v55 = vadd.f32 1e-05, %v1555_v7  ;;  %v3181_v35 = vpop.f32.mrb[40].mxu0 }
 0x6e9   :  { %3640 = vrsqrt.f32 %v1564_v47  ;;  %v1791_v52 = vsub.f32 %v3181_v35, %v1789_v41  ;;  %v1524_v26 = vpop.f32.mrb[41].mxu0  ;;  %v1573_v48 = vmul.f32 %v3631_v8, %v1533_v36 }
 0x6ea   :  { %v1586_v58 = vmul.f32 %v4489_v61, %v1574_v44  ;;  %3642 = vrsqrt.f32 %v1563_v55  ;;  %v1790_v50 = vsub.f32 %v1524_v26, %v1788_v43 }
 0x6eb   :  { %v3633_v28 = vpop.eup %3632  ;;  %v1793_v25 = vadd.f32 1e-05, %v1791_v52  ;;  %v1585_v7 = vmul.f32 %v4489_v61, %v1573_v48 }
 0x6ec   :  { %v3635_v0 = vpop.eup %3634  ;;  %v1792_v27 = vadd.f32 1e-05, %v1790_v50  ;;  %v1576_v47 = vmul.f32 %v3633_v28, %v1536_v19  ;;  %v1598_v29 = vadd.f32 %v1596_v18, %v1586_v58  ;;  %v1801_v50 = vrot.slane %v4519_v49, %v3905_v20 }
 0x6ed   :  { %3644 = vrsqrt.f32 %v1793_v25  ;;  %v1597_v41 = vadd.f32 %v1596_v18, %v1585_v7  ;;  %v1575_v36 = vmul.f32 %v3635_v0, %v1535_v34  ;;  %v1787_v28 = vsub.f32 %v4393_v38, %v4471_v32 }
 0x6ee   :  { %3646 = vrsqrt.f32 %v1792_v27  ;;  %v1588_v8 = vmul.f32 %v4489_v61, %v1576_v47  ;;  %v4824_v47 = vsub.s32 3, %v3827_v56 }
 0x6ef   :  { %v3637_v43 = vpop.eup %3636  ;;  %3198 = vmatprep.mubr.msk.f32.mxu1 %vm206_vm4, %v1597_v41  ;;  %v1587_v17 = vmul.f32 %v4489_v61, %v1575_v36 }
 0x6f0   :  { %v3639_v44 = vpop.eup %3638  ;;  %3199 = vmatmul.mubr.msk.f32.vlgmr.msra.gmra.mrb[38].mxu1 %vm206_vm4, %v1598_v29  ;;  %v1578_v55 = vmul.f32 %v3637_v43, %v1538_v13  ;;  %v1600_v27 = vadd.f32 %v1596_v18, %v1588_v8  ;;  %v1807_v41 = vrot.slane %v4519_v49, %v4824_v47 }
 0x6f1   :  { %v1599_v35 = vadd.f32 %v1596_v18, %v1587_v17  ;;  %v1577_v52 = vmul.f32 %v3639_v44, %v1537_v45 }
 0x6f2   :  { %v1590_v59 = vmul.f32 %v4489_v61, %v1578_v55 }
 0x6f3   :  { %v3641_v26 = vpop.eup %3640  ;;  %3201 = vmatprep.mubr.msk.f32.mxu1 %vm206_vm4, %v1599_v35  ;;  %v1589_v48 = vmul.f32 %v4489_v61, %v1577_v52 }
 0x6f4   :  { %v3643_v19 = vpop.eup %3642  ;;  %3202 = vmatmul.mubr.msk.f32.gmra.mrb[40].mxu1 %vm206_vm4, %v1600_v27  ;;  %v1580_v39 = vmul.f32 %v3641_v26, %v1540_v42  ;;  %v1602_v34 = vadd.f32 %v1596_v18, %v1590_v59 }
 0x6f5   :  { %v1601_v60 = vadd.f32 %v1596_v18, %v1589_v48  ;;  %v1579_v58 = vmul.f32 %v3643_v19, %v1539_v30 }
 0x6f6   :  { %v1592_v25 = vmul.f32 %v4489_v61, %v1580_v39 }
 0x6f7   :  { %v3645_v51 = vpop.eup %3644  ;;  %3204 = vmatprep.mubr.msk.f32.mxu1 %vm206_vm4, %v1601_v60  ;;  %v1591_v7 = vmul.f32 %v4489_v61, %v1579_v58  ;;  %v4825_v61 = vsub.s32 5, %v3827_v56 }
 0x6f8   :  { %v3647_v0 = vpop.eup %3646  ;;  %v1797_v36 = vmul.f32 %v3645_v51, %v1787_v28  ;;  %3205 = vmatmul.mubr.msk.f32.gmra.mrb[42].mxu1 %vm206_vm4, %v1602_v34  ;;  %v1604_v13 = vadd.f32 %v1596_v18, %v1592_v25 }
 0x6f9   :  { %v1796_v38 = vmul.f32 %v3647_v0, %v1786_v31  ;;  %v1603_v32 = vadd.f32 %v1596_v18, %v1591_v7  ;;  %v1616_v43 = vrot.slane %v4519_v49, %v4825_v61 }
 0x6fa   :  { %v1803_v29 = vmul.f32 %v1801_v50, %v1797_v36 }
 0x6fb   :  { %3207 = vmatprep.mubr.msk.f32.mxu1 %vm206_vm4, %v1603_v32  ;;  %v1802_v8 = vmul.f32 %v1801_v50, %v1796_v38 }
 0x6fc   :  { %3208 = vmatmul.mubr.msk.f32.gmra.mrb[44].mxu1 %vm206_vm4, %v1604_v13  ;;  %v4541_v4 = vadd.f32 %v1807_v41, %v1803_v29 }
 0x6fd   :  { %v4543_v33 = vadd.f32 %v1807_v41, %v1802_v8 }
 0x6fe   :  { %v1813_v30 = vmul.f32 0.70710677, %v4541_v4 }
 0x6ff   :  { %v1812_v56 = vmul.f32 0.70710677, %v4543_v33 }
 0x7c3   :  { %v3200_v45 = vpop.f32.mrb[38].mxu1 }
 0x7c4   :  { %v1713_v17 = vadd.f32 %v3200_v45, %v1616_v43  ;;  %v1707_v44 = vpop.f32.mrb[39].mxu1 }
 0x7c5   :  { %v1708_v55 = vadd.f32 %v1707_v44, %v1616_v43 }
 0x7c6   :  { %v1755_v35 = vmul.f32 0.70710677, %v1713_v17  ;;  %v1747_v41 = vmul.f32 0.5, %v1713_v17 }
 0x7c7   :  { %v1754_v18 = vmul.f32 0.70710677, %v1708_v55  ;;  %v3203_v52 = vpop.f32.mrb[40].mxu1  ;;  %v1746_v32 = vmul.f32 0.5, %v1708_v55 }
 0x7c8   :  { %3648 = verf.f32 %v1755_v35  ;;  %v1723_v42 = vadd.f32 %v3203_v52, %v1616_v43  ;;  %v1717_v27 = vpop.f32.mrb[41].mxu1 }
 0x7c9   :  { %3650 = verf.f32 %v1754_v18  ;;  %v1718_v59 = vadd.f32 %v1717_v27, %v1616_v43 }
 0x7ca   :  { %v1757_v26 = vmul.f32 0.70710677, %v1723_v42  ;;  %v1749_v44 = vmul.f32 0.5, %v1723_v42 }
 0x7cb   :  { %v1756_v48 = vmul.f32 0.70710677, %v1718_v59  ;;  %v3206_v19 = vpop.f32.mrb[42].mxu1 }
 0x7cc   :  { %3652 = verf.f32 %v1757_v26  ;;  %v1733_v39 = vadd.f32 %v3206_v19, %v1616_v43  ;;  %v1727_v60 = vpop.f32.mrb[43].mxu1 }
 0x7cd   :  { %3654 = verf.f32 %v1756_v48  ;;  %v1728_v58 = vadd.f32 %v1727_v60, %v1616_v43 }
 0x7ce   :  { %v1759_v50 = vmul.f32 0.70710677, %v1733_v39  ;;  %3656 = verf.f32 %v1813_v30  ;;  %v1751_v19 = vmul.f32 0.5, %v1733_v39  ;;  %v1811_v39 = vmul.f32 0.5, %v4541_v4 }
 0x7cf   :  { %v1758_v28 = vmul.f32 0.70710677, %v1728_v58  ;;  %v3209_v34 = vpop.f32.mrb[44].mxu1  ;;  %3658 = verf.f32 %v1812_v56  ;;  %v1750_v60 = vmul.f32 0.5, %v1728_v58 }
 0x7d0   :  { %3660 = verf.f32 %v1759_v50  ;;  %v1743_v25 = vadd.f32 %v3209_v34, %v1616_v43  ;;  %v1737_v51 = vpop.f32.mrb[45].mxu1 }
 0x7d1   :  { %3662 = verf.f32 %v1758_v28  ;;  %v1738_v31 = vadd.f32 %v1737_v51, %v1616_v43  ;;  %v1748_v43 = vmul.f32 0.5, %v1718_v59 }
 0x7d2   :  { %v3649_v7 = vpop.eup %3648  ;;  %v1761_v0 = vmul.f32 0.70710677, %v1743_v25 }
 0x7d3   :  { %v3651_v47 = vpop.eup %3650  ;;  %v1771_v36 = vadd.f32 1.0, %v3649_v7  ;;  %v1760_v38 = vmul.f32 0.70710677, %v1738_v31 }
 0x7d4   :  { %v1770_v13 = vadd.f32 1.0, %v3651_v47  ;;  %3664 = verf.f32 %v1761_v0  ;;  %v1753_v47 = vmul.f32 0.5, %v1743_v25 }
 0x7d5   :  { %v4550_v29 = vmul.f32 %v1771_v36, %v1747_v41  ;;  %3666 = verf.f32 %v1760_v38  ;;  %v1752_v36 = vmul.f32 0.5, %v1738_v31 }
 0x7d6   :  { %v3653_v8 = vpop.eup %3652  ;;  %v4552_v61 = vmul.f32 %v1770_v13, %v1746_v32  ;;  %v1810_v32 = vmul.f32 0.5, %v4543_v33 }
 0x7d7   :  { %v3655_v45 = vpop.eup %3654  ;;  %v1773_v35 = vadd.f32 1.0, %v3653_v8 }
 0x7d8   :  { %v3657_v18 = vpop.eup %3656  ;;  %v1772_v52 = vadd.f32 1.0, %v3655_v45  ;;  %v3490_v17 = vpack.c.bf16 %v4550_v29, %v4552_v61 }
 0x7d9   :  { %v3659_v27 = vpop.eup %3658  ;;  %v4556_v26 = vmul.f32 %v1773_v35, %v1749_v44  ;;  %v1817_v7 = vadd.f32 1.0, %v3657_v18 }
 0x7da   :  { %v3661_v55 = vpop.eup %3660  ;;  %v4558_v30 = vmul.f32 %v1772_v52, %v1748_v43  ;;  %3491 = vmatprep.subr.bf16.mxu0 %v3490_v17  ;;  %v1816_v51 = vadd.f32 1.0, %v3659_v27 }
 0x7db   :  { %v3663_v48 = vpop.eup %3662  ;;  %v1775_v56 = vadd.f32 1.0, %v3661_v55  ;;  %3493 = vmatpush3.bf16.msra.mxu0 %v3490_v17  ;;  %v4576_v44 = vmul.f32 %v1817_v7, %v1811_v39  ;;  %v2169_v7 = vld [vmem:[%s4817_s3 + $0xd8] sm:$0xff] }
 0x7dc   :  { %v1774_v42 = vadd.f32 1.0, %v3663_v48  ;;  %v3494_v59 = vpack.c.bf16 %v4556_v26, %v4558_v30  ;;  %v4574_v45 = vmul.f32 %v1816_v51, %v1810_v32  ;;  %v2168_v51 = vld [vmem:[%s4817_s3 + $0xd0] sm:$0xff] }
 0x7dd   :  { %v4562_v50 = vmul.f32 %v1775_v56, %v1751_v19  ;;  %v3530_v39 = vpack.c.bf16 %v2169_v7, %v2168_v51 }
 0x7de   :  { %v3665_v28 = vpop.eup %3664  ;;  %v4564_v34 = vmul.f32 %v1774_v42, %v1750_v60  ;;  %3495 = vmatprep.subr.bf16.mxu0 %v3494_v59  ;;  %v3506_v25 = vpack.c.bf16 %v4576_v44, %v4574_v45 }
 0x7df   :  { %v3667_v0 = vpop.eup %3666  ;;  %v1777_v41 = vadd.f32 1.0, %v3665_v28  ;;  %3497 = vmatpush3.bf16.msra.mxu0 %v3494_v59 }
 0x7e0   :  { %v1776_v58 = vadd.f32 1.0, %v3667_v0  ;;  %v3498_v38 = vpack.c.bf16 %v4562_v50, %v4564_v34 }
 0x7e1   :  { %v4570_v13 = vmul.f32 %v1777_v41, %v1753_v47 }
 0x7e2   :  { %v4572_v8 = vmul.f32 %v1776_v58, %v1752_v36  ;;  %3499 = vmatprep.subr.bf16.mxu0 %v3498_v38  ;;  %v2170_v58 = vld [vmem:[%s4817_s3 + $0xe0] sm:$0xff] }
 0x7e3   :  { %3501 = vmatpush3.bf16.msra.mxu0 %v3498_v38  ;;  %v2171_v38 = vld [vmem:[%s4817_s3 + $0xe8] sm:$0xff] }
 0x7e4   :  { %v3502_v4 = vpack.c.bf16 %v4570_v13, %v4572_v8 }
 0x7e6   :  { %3503 = vmatprep.subr.bf16.mxu0 %v3502_v4 }
 0x7e7   :  { %3505 = vmatpush3.bf16.msra.mxu0 %v3502_v4 }
 0x7e8   :  { %3507 = vmatprep.subr.bf16.mxu0 %v3506_v25 }
 0x7eb   :  { %3509 = vmatpush3.bf16.msra.mxu0 %v3506_v25  ;;  %v3534_v25 = vpack.c.bf16 %v2171_v38, %v2170_v58 }
 0x7ec   :  { %3559 = vmatprep.subr.bf16.mxu0 %v4276_v63 }
 0x7ee   :  { %3231 = vmatmul.mubr.msk.f32.vlgmr.msra.gmra.mrb[42].mxu0 %vm769_vm0, %v4066_v54  ;;  %v1985_v54 = vld [vmem:[%s4816_s2 + $0xa8] sm:$0xff] }
 0x7ef   :  { %3233 = vmatprep.mubr.msk.f32.mxu0 %vm769_vm0, %v4071_v46  ;;  %3561 = vmatpush3.bf16.msra.mxu0 %v4276_v63  ;;  %v1986_v46 = vld [vmem:[%s4816_s2 + $0xb0] sm:$0xff] }
 0x7f0   :  { %3563 = vmatprep.subr.bf16.mxu0 %v4327_v1 }
 0x7f2   :  { %3234 = vmatmul.mubr.msk.f32.gmra.mrb[44].mxu0 %vm769_vm0, %v4080_v14  ;;  %v1987_v14 = vld [vmem:[%s4816_s2 + $0xb8] sm:$0xff] }
 0x7f3   :  { %3236 = vmatprep.mubr.msk.f32.mxu0 %vm769_vm0, %v4085_v2  ;;  %3565 = vmatpush3.bf16.msra.mxu0 %v4327_v1  ;;  %v3510_v2 = vpack.c.bf16 %v1986_v46, %v1985_v54  ;;  %v2172_v54 = vld [vmem:[%s4817_s3 + $0xf0] sm:$0xff]  ;;  %v2173_v46 = vld [vmem:[%s4817_s3 + $0xf8] sm:$0xff] }
 0x7f4   :  { %3567 = vmatprep.subr.bf16.mxu0 %v4341_v62 }
 0x7f5   :  { %3511 = vmatprep.subr.bf16.mxu1 %v3510_v2 }
 0x7f6   :  { %3237 = vmatmul.mubr.msk.f32.gmra.mrb[46].mxu0 %vm769_vm0, %v4094_v3  ;;  %v1988_v3 = vld [vmem:[%s4816_s2 + $0xc0] sm:$0xff]  ;;  %3513 = vmatpush3.bf16.msra.mxu1 %v3510_v2 }
 0x7f7   :  { %3239 = vmatprep.mubr.msk.f32.mxu0 %vm769_vm0, %v4099_v5  ;;  %3569 = vmatpush3.bf16.msra.mxu0 %v4341_v62  ;;  %v3514_v5 = vpack.c.bf16 %v1988_v3, %v1987_v14  ;;  %v3538_v3 = vpack.c.bf16 %v2173_v46, %v2172_v54 }
 0x7f8   :  { %3571 = vmatprep.subr.bf16.mxu0 %v4352_v37 }
 0x7f9   :  { %3515 = vmatprep.subr.bf16.mxu1 %v3514_v5 }
 0x7fa   :  { %3240 = vmatmul.mubr.msk.f32.gmra.mrb[48].mxu0 %vm769_vm0, %v4108_v6  ;;  %v1989_v6 = vld [vmem:[%s4816_s2 + $0xc8] sm:$0xff]  ;;  %3517 = vmatpush3.bf16.msra.mxu1 %v3514_v5  ;;  %v2174_v5 = vld [vmem:[%s4817_s3 + $0x100] sm:$0xff] }
 0x7fb   :  { %3242 = vmatprep.mubr.msk.f32.mxu0 %vm769_vm0, %v4113_v9  ;;  %3573 = vmatpush3.bf16.msra.mxu0 %v4352_v37  ;;  %v1990_v9 = vld [vmem:[%s4816_s2 + $0xd0] sm:$0xff] }
 0x7fe   :  { %3243 = vmatmul.mubr.msk.f32.gmra.mrb[50].mxu0 %vm769_vm0, %v4122_v10  ;;  %v3518_v10 = vpack.c.bf16 %v1990_v9, %v1989_v6  ;;  %v2175_v6 = vld [vmem:[%s4817_s3 + $0x108] sm:$0xff] }
 0x7ff   :  { %3245 = vmatprep.mubr.msk.f32.mxu0 %vm769_vm0, %v4127_v12  ;;  %v1991_v12 = vld [vmem:[%s4816_s2 + $0xd8] sm:$0xff] }
 0x800   :  { %3519 = vmatprep.subr.bf16.mxu1 %v3518_v10 }
 0x801   :  { %3521 = vmatpush3.bf16.msra.mxu1 %v3518_v10  ;;  %v3542_v10 = vpack.c.bf16 %v2175_v6, %v2174_v5 }
 0x802   :  { %3246 = vmatmul.mubr.msk.f32.gmra.mrb[52].mxu0 %vm769_vm0, %v4136_v21  ;;  %v1992_v21 = vld [vmem:[%s4816_s2 + $0xe0] sm:$0xff] }
 0x803   :  { %3248 = vmatprep.mubr.msk.f32.mxu0 %vm769_vm0, %v4141_v15  ;;  %v3522_v15 = vpack.c.bf16 %v1992_v21, %v1991_v12  ;;  %v2176_v21 = vld [vmem:[%s4817_s3 + $0x110] sm:$0xff] }
 0x805   :  { %3523 = vmatprep.subr.bf16.mxu1 %v3522_v15 }
 0x806   :  { %3249 = vmatmul.mubr.msk.f32.gmra.mrb[54].mxu0 %vm769_vm0, %v4150_v22  ;;  %3525 = vmatpush3.bf16.msra.mxu1 %v3522_v15  ;;  %v2166_v22 = vld [vmem:[%s4817_s3 + $0xc0] sm:$0xff]  ;;  %v2177_v15 = vld [vmem:[%s4817_s3 + $0x118] sm:$0xff] }
 0x807   :  { %3251 = vmatprep.mubr.msk.f32.mxu0 %vm769_vm0, %v4155_v53  ;;  %v2167_v53 = vld [vmem:[%s4817_s3 + $0xc8] sm:$0xff] }
 0x80a   :  { %3252 = vmatmul.mubr.msk.f32.gmra.mrb[56].mxu0 %vm769_vm0, %v4164_v16  ;;  %v3526_v16 = vpack.c.bf16 %v2167_v53, %v2166_v22  ;;  %v3546_v22 = vpack.c.bf16 %v2177_v15, %v2176_v21  ;;  %v2178_v53 = vld [vmem:[%s4817_s3 + $0x120] sm:$0xff] }
 0x80b   :  { %3254 = vmatprep.mubr.msk.f32.mxu0 %vm769_vm0, %v4169_v23 }
 0x80c   :  { %3527 = vmatprep.subr.bf16.mxu1 %v3526_v16 }
 0x80e   :  { %3255 = vmatmul.mubr.msk.f32.gmra.mrb[58].mxu0 %vm769_vm0, %v4178_v24 }
 0x8c1   :  { %v3232_v23 = vpop.f32.mrb[42].mxu0 }
 0x8c2   :  { %1979 = vrot.lane.b32.xlu1 %v3232_v23, %s3701_s14  ;;  %v1886_v24 = vpop.f32.mrb[43].mxu0 }
 0x8c3   :  { %1977 = vrot.lane.b32.xlu0 %v1886_v24, %s3701_s14 }
 0x8c5   :  { %v3235_v33 = vpop.f32.mrb[44].mxu0 }
 0x8c6   :  { %2120 = vrot.lane.b32.xlu1 %v3235_v33, %s3702_s30  ;;  %v1896_v31 = vpop.f32.mrb[45].mxu0 }
 0x8c7   :  { %2118 = vrot.lane.b32.xlu0 %v1896_v31, %s3702_s30 }
 0x8c9   :  { %v3238_v35 = vpop.f32.mrb[46].mxu0 }
 0x8ca   :  { %2124 = vrot.lane.b32.xlu1 %v3238_v35, %s3702_s30  ;;  %v1906_v18 = vpop.f32.mrb[47].mxu0 }
 0x8cb   :  { %2122 = vrot.lane.b32.xlu0 %v1906_v18, %s3702_s30  ;;  %v2180_v18 = vld [vmem:[%s4817_s3 + $0x130] sm:$0xff] }
 0x8cd   :  { %v3241_v43 = vpop.f32.mrb[48].mxu0 }
 0x8ce   :  { %2128 = vrot.lane.b32.xlu1 %v3241_v43, %s3702_s30  ;;  %v1916_v52 = vpop.f32.mrb[49].mxu0  ;;  %v2181_v43 = vld [vmem:[%s4817_s3 + $0x138] sm:$0xff] }
 0x8cf   :  { %2126 = vrot.lane.b32.xlu0 %v1916_v52, %s3702_s30 }
 0x8d1   :  { %v3244_v17 = vpop.f32.mrb[50].mxu0 }
 0x8d2   :  { %v1926_v27 = vpop.f32.mrb[51].mxu0 }
 0x8d5   :  { %v3247_v55 = vpop.f32.mrb[52].mxu0 }
 0x8d6   :  { %2088 = vrot.lane.b32.xlu1 %v3247_v55, %s3701_s14  ;;  %v1936_v48 = vpop.f32.mrb[53].mxu0 }
 0x8d7   :  { %2086 = vrot.lane.b32.xlu0 %v1936_v48, %s3701_s14 }
 0x8d9   :  { %v3250_v19 = vpop.f32.mrb[54].mxu0 }
 0x8da   :  { %2092 = vrot.lane.b32.xlu1 %v3250_v19, %s3701_s14  ;;  %v1946_v56 = vpop.f32.mrb[55].mxu0 }
 0x8db   :  { %2090 = vrot.lane.b32.xlu0 %v1946_v56, %s3701_s14 }
 0x8dd   :  { %v3253_v60 = vpop.f32.mrb[56].mxu0 }
 0x8de   :  { %2096 = vrot.lane.b32.xlu1 %v3253_v60, %s3701_s14  ;;  %v1956_v42 = vpop.f32.mrb[57].mxu0 }
 0x8df   :  { %2094 = vrot.lane.b32.xlu0 %v1956_v42, %s3701_s14 }
 0x8e1   :  { %v3256_v59 = vpop.f32.mrb[58].mxu0 }
 0x8e2   :  { %2100 = vrot.lane.b32.xlu1 %v3256_v59, %s3701_s14  ;;  %v1966_v28 = vpop.f32.mrb[59].mxu0 }
 0x8e3   :  { %2098 = vrot.lane.b32.xlu0 %v1966_v28, %s3701_s14 }
 0x8e6   :  { %2132 = vrot.lane.b32.xlu1 %v3244_v17, %s3702_s30 }
 0x8e7   :  { %2130 = vrot.lane.b32.xlu0 %v1926_v27, %s3702_s30  ;;  %v3554_v27 = vpack.c.bf16 %v2181_v43, %v2180_v18 }
 0x934   :  { %v1980_v0 = vpop.permute.xlu1 %1979 }
 0x935   :  { %v1978_v47 = vpop.permute.xlu0 %1977  ;;  %v1984_v36 = vsel %vm179_vm3, %v4576_v44, %v1980_v0 }
 0x936   :  { %v1983_v41 = vsel %vm179_vm3, %v4574_v45, %v1978_v47 }
 0x937   :  { %3273 = vmatprep.mubr.msk.f32.mxu1 %vm206_vm4, %v1983_v41 }
 0x938   :  { %3274 = vmatmul.mubr.msk.f32.vlgmr.msra.gmra.mrb[46].mxu1 %vm206_vm4, %v1984_v36  ;;  %v2121_v32 = vpop.permute.xlu1 %2120 }
 0x939   :  { %3529 = vmatpush3.bf16.msra.mxu1 %v3526_v16  ;;  %v2119_v4 = vpop.permute.xlu0 %2118  ;;  %v2179_v16 = vld [vmem:[%s4817_s3 + $0x128] sm:$0xff]  ;;  %s3703_s3 = smov [#allocation2]  }
 0x93a   :  { %3531 = vmatprep.subr.bf16.mxu1 %v3530_v39  ;;  %v3550_v31 = vpack.c.bf16 %v2179_v16, %v2178_v53  ;;  %s2563_s2 = sshll.u32 %s3703_s3, 4  ;;  %s2564_s2 = int_to_ptr.vmem [resolvable:$true] %s2563_s2 }
 0x93b   :  { %s3676_s24 = scalar_lea.vmem %s2564_s2, 256  ;;  %p3681_p1 = scmp.lt.s32.totalorder %s2564_s2, %s2564_s2 }
 0x93c   :  { %v2125_v14 = vpop.permute.xlu1 %2124  ;;  %p3677_p0 = scmp.ne.s32.totalorder %s2564_s2, %s3676_s24  ;;  %p3682_p2 = scmp.lt.s32.totalorder %s3676_s24, %s3676_s24 }
 0x93d   :  { %3533 = vmatpush3.bf16.msra.mxu1 %v3530_v39  ;;  %v2123_v2 = vpop.permute.xlu0 %2122  ;;  %v2185_v39 = vrot.slane %v4359_v40, %v3905_v20 }
 0x93e   :  { %3535 = vmatprep.subr.bf16.mxu1 %v3534_v25  ;;  %p3683_p3 = por %p3682_p2, %p3681_p1 }
 0x940   :  { %v2129_v9 = vpop.permute.xlu1 %2128  ;;  %p3684_p4 = pnand %p3683_p3, %p3677_p0 }
 0x941   :  { %3537 = vmatpush3.bf16.msra.mxu1 %v3534_v25  ;;  %v2127_v12 = vpop.permute.xlu0 %2126 }
 0x942   :  { %3539 = vmatprep.subr.bf16.mxu1 %v3538_v3 }
 0x945   :  { %3541 = vmatpush3.bf16.msra.mxu1 %v3538_v3 }
 0x946   :  { %3543 = vmatprep.subr.bf16.mxu1 %v3542_v10 }
 0x948   :  { %v2089_v23 = vpop.permute.xlu1 %2088 }
 0x949   :  { %3545 = vmatpush3.bf16.msra.mxu1 %v3542_v10  ;;  %v2087_v24 = vpop.permute.xlu0 %2086  ;;  %v2143_v55 = vsel %vm179_vm3, %v4550_v29, %v2089_v23 }
 0x94a   :  { %v2142_v33 = vsel %vm179_vm3, %v4552_v61, %v2087_v24  ;;  %3547 = vmatprep.subr.bf16.mxu1 %v3546_v22  ;;  %v2151_v56 = vsel %vm206_vm4, %v2143_v55, %v2121_v32 }
 0x94b   :  { %v2150_v35 = vsel %vm206_vm4, %v2142_v33, %v2119_v4 }
 0x94c   :  { %3308 = vmatprep.mubr.msk.f32.mxu1 %vm1162_vm1, %v2150_v35  ;;  %v2093_v17 = vpop.permute.xlu1 %2092 }
 0x94d   :  { %3549 = vmatpush3.bf16.msra.mxu1 %v3546_v22  ;;  %v2091_v52 = vpop.permute.xlu0 %2090  ;;  %v2145_v42 = vsel %vm179_vm3, %v4556_v26, %v2093_v17 }
 0x94e   :  { %3551 = vmatprep.subr.bf16.mxu1 %v3550_v31  ;;  %v2144_v19 = vsel %vm179_vm3, %v4558_v30, %v2091_v52  ;;  %v2153_v28 = vsel %vm206_vm4, %v2145_v42, %v2125_v14 }
 0x94f   :  { %v2152_v59 = vsel %vm206_vm4, %v2144_v19, %v2123_v2 }
 0x950   :  { %v2097_v48 = vpop.permute.xlu1 %2096 }
 0x951   :  { %3553 = vmatpush3.bf16.msra.mxu1 %v3550_v31  ;;  %v2095_v61 = vpop.permute.xlu0 %2094  ;;  %v2147_v51 = vsel %vm179_vm3, %v4562_v50, %v2097_v48 }
 0x952   :  { %3555 = vmatprep.subr.bf16.mxu1 %v3554_v27  ;;  %v2146_v29 = vsel %vm179_vm3, %v4564_v34, %v2095_v61  ;;  %v2155_v34 = vsel %vm206_vm4, %v2147_v51, %v2129_v9 }
 0x953   :  { %v2154_v26 = vsel %vm206_vm4, %v2146_v29, %v2127_v12 }
 0x954   :  { %v2101_v30 = vpop.permute.xlu1 %2100 }
 0x955   :  { %3557 = vmatpush3.bf16.msra.mxu1 %v3554_v27  ;;  %v2099_v60 = vpop.permute.xlu0 %2098  ;;  %v2149_v50 = vsel %vm179_vm3, %v4570_v13, %v2101_v30 }
 0x956   :  { %3574 = vmatprep.subr.bf16.mxu1 %v4276_v63 }
 0x958   :  { %3309 = vmatmul.mubr.msk.f32.vlgmr.msra.gmra.mrb[48].mxu1 %vm1162_vm1, %v2151_v56  ;;  %v2133_v0 = vpop.permute.xlu1 %2132 }
 0x959   :  { %3311 = vmatprep.mubr.msk.f32.mxu1 %vm1162_vm1, %v2152_v59  ;;  %3578 = vmatpush3.bf16.msra.mxu1 %v4276_v63  ;;  %v2131_v7 = vpop.permute.xlu0 %2130  ;;  %v2148_v63 = vsel %vm179_vm3, %v4572_v8, %v2099_v60 }
 0x95a   :  { %3575 = vmatprep.subr.bf16.mxu1 %v4327_v1  ;;  %v2156_v47 = vsel %vm206_vm4, %v2148_v63, %v2131_v7 }
 0x95c   :  { %3312 = vmatmul.mubr.msk.f32.gmra.mrb[50].mxu1 %vm1162_vm1, %v2153_v28 }
 0x95d   :  { %3314 = vmatprep.mubr.msk.f32.mxu1 %vm1162_vm1, %v2154_v26  ;;  %3579 = vmatpush3.bf16.msra.mxu1 %v4327_v1  ;;  %v2157_v1 = vsel %vm206_vm4, %v2149_v50, %v2133_v0 }
 0x95e   :  { %3576 = vmatprep.subr.bf16.mxu1 %v4341_v62 }
 0x960   :  { %3315 = vmatmul.mubr.msk.f32.gmra.mrb[52].mxu1 %vm1162_vm1, %v2155_v34 }
 0x961   :  { %3317 = vmatprep.mubr.msk.f32.mxu1 %vm1162_vm1, %v2156_v47  ;;  %3580 = vmatpush3.bf16.msra.mxu1 %v4341_v62 }
 0x962   :  { %3577 = vmatprep.subr.bf16.mxu1 %v4352_v37 }
 0x964   :  { %3318 = vmatmul.mubr.msk.f32.gmra.mrb[54].mxu1 %vm1162_vm1, %v2157_v1 }
 0x965   :  { %3581 = vmatpush3.bf16.msra.mxu1 %v4352_v37  ;;  %v1996_v37 = vrot.slane %v4519_v49, %v3830_v57 }
 0xa0b   :  { %v3275_v8 = vpop.f32.mrb[46].mxu1 }
 0xa0c   :  { %v2069_v41 = vpop.f32.mrb[47].mxu1  ;;  %v2075_v57 = vadd.f32 %v3275_v8, %v1996_v37 }
 0xa0d   :  { %v4768_v14 = vadd.f32 %v2069_v41, %v1996_v37  ;;  %v2527_v41 = vrot.slane %v4519_v49, %v3846_v11 }
 0xa0e   :  { %v2292_v22 = vsel %vm179_vm3, %v2075_v57, 0.0 }
 0xa0f   :  { %v2291_v12 = vsel %vm179_vm3, %v4768_v14, 0.0  ;;  %v2302_v23 = vmul.f32 %v2292_v22, %v2292_v22 }
 0xa10   :  { %v2301_v53 = vmul.f32 %v2291_v12, %v2291_v12 }
 0xa2b   :  { %v3310_v36 = vpop.f32.mrb[48].mxu1 }
 0xa2c   :  { %v2258_v58 = vadd.f32 %v3310_v36, %v2185_v39  ;;  %v2252_v38 = vpop.f32.mrb[49].mxu1 }
 0xa2d   :  { %v2253_v62 = vadd.f32 %v2252_v38, %v2185_v39 }
 0xa2e   :  { %v2294_v24 = vmul.f32 %v2258_v58, %v2258_v58 }
 0xa2f   :  { %v3313_v32 = vpop.f32.mrb[50].mxu1  ;;  %3336 = vmatprep.mubr.msk.f32.mxu0 %vm206_vm4, %v2253_v62  ;;  %v2293_v16 = vmul.f32 %v2253_v62, %v2253_v62  ;;  %v4826_v62 = vld [vmem:[#allocation5_spill] sm:$0xff] }
 0xa30   :  { %v2268_v13 = vadd.f32 %v3313_v32, %v2185_v39  ;;  %v2262_v4 = vpop.f32.mrb[51].mxu1  ;;  %3337 = vmatmul.mubr.msk.f32.vlgmr.msra.gmra.mrb[60].mxu0 %vm206_vm4, %v2258_v58  ;;  %v2533_v32 = vrot.slane %v4519_v49, %v4826_v62 }
 0xa31   :  { %v2263_v25 = vadd.f32 %v2262_v4, %v2185_v39 }
 0xa32   :  { %v2296_v31 = vmul.f32 %v2268_v13, %v2268_v13 }
 0xa33   :  { %v3316_v54 = vpop.f32.mrb[52].mxu1  ;;  %3339 = vmatprep.mubr.msk.f32.mxu0 %vm206_vm4, %v2263_v25  ;;  %v2295_v33 = vmul.f32 %v2263_v25, %v2263_v25 }
 0xa34   :  { %v2278_v46 = vadd.f32 %v3316_v54, %v2185_v39  ;;  %v2272_v20 = vpop.f32.mrb[53].mxu1  ;;  %3340 = vmatmul.mubr.msk.f32.gmra.mrb[62].mxu0 %vm206_vm4, %v2268_v13 }
 0xa35   :  { %v2273_v40 = vadd.f32 %v2272_v20, %v2185_v39 }
 0xa36   :  { %v2298_v5 = vmul.f32 %v2278_v46, %v2278_v46 }
 0xa37   :  { %v2297_v2 = vmul.f32 %v2273_v40, %v2273_v40  ;;  %v3319_v3 = vpop.f32.mrb[54].mxu1  ;;  %3342 = vmatprep.mubr.msk.f32.mxu0 %vm206_vm4, %v2273_v40 }
 0xa38   :  { %v2288_v6 = vadd.f32 %v3319_v3, %v2185_v39  ;;  %v2282_v9 = vpop.f32.mrb[55].mxu1  ;;  %3343 = vmatmul.mubr.msk.f32.gmra.mrb[64].mxu0 %vm206_vm4, %v2278_v46 }
 0xa39   :  { %v2283_v10 = vadd.f32 %v2282_v9, %v2185_v39  ;;  %3357 = vmatprep.mubr.msk.f32.mxu1 %vm206_vm4, %v2297_v2 }
 0xa3a   :  { %3358 = vmatmul.mubr.msk.f32.vlgmr.msra.gmra.mrb[56].mxu1 %vm206_vm4, %v2298_v5  ;;  %v2300_v15 = vmul.f32 %v2288_v6, %v2288_v6 }
 0xa3b   :  { %v2299_v21 = vmul.f32 %v2283_v10, %v2283_v10  ;;  %3345 = vmatprep.mubr.msk.f32.mxu0 %vm206_vm4, %v2283_v10 }
 0xa3c   :  { %3346 = vmatmul.mubr.msk.f32.gmra.mrb[66].mxu0 %vm206_vm4, %v2288_v6 }
 0xa3d   :  { %3348 = vmatprep.mubr.msk.f32.mxu0 %vm206_vm4, %v2291_v12  ;;  %3360 = vmatprep.mubr.msk.f32.mxu1 %vm206_vm4, %v2299_v21 }
 0xa3e   :  { %3361 = vmatmul.mubr.msk.f32.gmra.mrb[58].mxu1 %vm206_vm4, %v2300_v15 }
 0xa3f   :  { %3363 = vmatprep.mubr.msk.f32.mxu1 %vm206_vm4, %v2301_v53 }
 0xa40   :  { %3349 = vmatmul.mubr.msk.f32.gmra.mrb[68].mxu0 %vm206_vm4, %v2292_v22 }
 0xa41   :  { %3351 = vmatprep.mubr.msk.f32.mxu0 %vm206_vm4, %v2293_v16 }
 0xa42   :  { %3364 = vmatmul.mubr.msk.f32.gmra.mrb[60].mxu1 %vm206_vm4, %v2302_v23 }
 0xa44   :  { %3352 = vmatmul.mubr.msk.f32.gmra.mrb[70].mxu0 %vm206_vm4, %v2294_v24 }
 0xa45   :  { %3354 = vmatprep.mubr.msk.f32.mxu0 %vm206_vm4, %v2295_v33 }
 0xa48   :  { %3355 = vmatmul.mubr.msk.f32.gmra.mrb[72].mxu0 %vm206_vm4, %v2296_v31 }
 0xb03   :  { %v3338_v35 = vpop.f32.mrb[60].mxu0 }
 0xb04   :  { %v2429_v18 = vpop.f32.mrb[61].mxu0 }
 0xb07   :  { %v3341_v43 = vpop.f32.mrb[62].mxu0 }
 0xb08   :  { %v2437_v52 = vpop.f32.mrb[63].mxu0 }
 0xb0b   :  { %v3344_v17 = vpop.f32.mrb[64].mxu0 }
 0xb0c   :  { %v2445_v27 = vpop.f32.mrb[65].mxu0 }
 0xb0d   :  { %v3359_v61 = vpop.f32.mrb[56].mxu1 }
 0xb0e   :  { %v2487_v55 = vpop.f32.mrb[57].mxu1 }
 0xb0f   :  { %v3347_v48 = vpop.f32.mrb[66].mxu0 }
 0xb10   :  { %v2453_v19 = vpop.f32.mrb[67].mxu0 }
 0xb11   :  { %v3362_v56 = vpop.f32.mrb[58].mxu1 }
 0xb12   :  { %v2495_v60 = vpop.f32.mrb[59].mxu1 }
 0xb13   :  { %v3350_v42 = vpop.f32.mrb[68].mxu0 }
 0xb14   :  { %v2515_v59 = vmul.f32 %v3350_v42, %v3350_v42  ;;  %v2461_v29 = vpop.f32.mrb[69].mxu0  ;;  %v2513_v8 = vsub.f32 %v2075_v57, %v3350_v42 }
 0xb15   :  { %v2514_v30 = vmul.f32 %v2461_v29, %v2461_v29  ;;  %v3365_v28 = vpop.f32.mrb[60].mxu1  ;;  %v2512_v36 = vsub.f32 %v4768_v14, %v2461_v29 }
 0xb16   :  { %v2517_v51 = vsub.f32 %v3365_v28, %v2515_v59  ;;  %v2503_v26 = vpop.f32.mrb[61].mxu1 }
 0xb17   :  { %v2516_v7 = vsub.f32 %v2503_v26, %v2514_v30  ;;  %v3353_v63 = vpop.f32.mrb[70].mxu0 }
 0xb18   :  { %v2519_v34 = vadd.f32 1e-05, %v2517_v51  ;;  %v2471_v0 = vpop.f32.mrb[71].mxu0 }
 0xb19   :  { %v2518_v47 = vadd.f32 1e-05, %v2516_v7 }
 0xb1a   :  { %3668 = vrsqrt.f32 %v2519_v34 }
 0xb1b   :  { %3670 = vrsqrt.f32 %v2518_v47  ;;  %v3356_v50 = vpop.f32.mrb[72].mxu0 }
 0xb1c   :  { %v2479_v1 = vpop.f32.mrb[73].mxu0 }
 0xb24   :  { %v3669_v39 = vpop.eup %3668 }
 0xb25   :  { %v3671_v58 = vpop.eup %3670  ;;  %v2523_v38 = vmul.f32 %v3669_v39, %v2513_v8 }
 0xb26   :  { %v2522_v13 = vmul.f32 %v3671_v58, %v2512_v36 }
 0xb27   :  { %v2529_v4 = vmul.f32 %v2527_v41, %v2523_v38 }
 0xb28   :  { %v2528_v25 = vmul.f32 %v2527_v41, %v2522_v13 }
 0xb29   :  { %v2535_v37 = vadd.f32 %v2533_v32, %v2529_v4 }
 0xb2a   :  { %v2534_v54 = vadd.f32 %v2533_v32, %v2528_v25 }
 0xb2b   :  { %v2539_v46 = vmul.f32 0.70710677, %v2535_v37  ;;  %v2537_v11 = vmul.f32 0.5, %v2535_v37 }
 0xb2c   :  { %v2538_v20 = vmul.f32 0.70710677, %v2534_v54  ;;  %v2536_v5 = vmul.f32 0.5, %v2534_v54 }
 0xb2d   :  { %3672 = verf.f32 %v2539_v46 }
 0xb2e   :  { %3674 = verf.f32 %v2538_v20 }
 0xb37   :  { %v3673_v40 = vpop.eup %3672 }
 0xb38   :  { %v3675_v2 = vpop.eup %3674  ;;  %v2543_v3 = vadd.f32 1.0, %v3673_v40 }
 0xb39   :  { %v2542_v14 = vadd.f32 1.0, %v3675_v2 }
 0xb3a   :  { %v2545_v6 = vmul.f32 %v2543_v3, %v2537_v11 }
 0xb3b   :  { %v2544_v9 = vmul.f32 %v2542_v14, %v2536_v5 }
 0xb3c   :  { %2550 = vrot.lane.b32.xlu1 %v2545_v6, %s3701_s14 }
 0xb3d   :  { %2548 = vrot.lane.b32.xlu0 %v2544_v9, %s3701_s14 }
 0xbae   :  { %v2551_v49 = vpop.permute.xlu1 %2550 }
 0xbaf   :  { %v2555_v57 = vsel %vm179_vm3, %v4576_v44, %v2551_v49  ;;  %v2549_v10 = vpop.permute.xlu0 %2548 }
 0xbb0   :  { %2557 = vst.msk [vmem:[#allocation2 + $0x8] sm:$0xff] %vm206_vm4, %v2555_v57  ;;  %v2554_v12 = vsel %vm179_vm3, %v4574_v45, %v2549_v10 }
 0xbb1   :  { %2556 = vst.msk [vmem:[#allocation2] sm:$0xff] %vm206_vm4, %v2554_v12 }
 0xbb2   :  { %3687 = shalt.err (!%p3684_p4)
}
 0xbb3   :  { %s3688_s26 = scalar_lea.hbm %s4819_s5, 256 }
 0xbb4   :  { %p3689_p5 = scmp.ne.s32.totalorder %s4819_s5, %s3688_s26  ;;  %p3692_p6 = scmp.lt.u32.totalorder %s3688_s26, %s4819_s5 }
 0xbb6   :  { %p3694_p7 = pnand %p3692_p6, %p3689_p5 }
 0xbb8   :  { %3697 = shalt.err (!%p3694_p7)
}
 0xbb9   :  { %s3704_s0 = smov 128   ;;  %s3705_s6 = smov 8  }
 0xbba   :  { %2569 = dma.vmem_to_hbm [thread:$0]  %s2564_s2, 256, %s4819_s5, [#allocation3], %s3704_s0, %s3704_s0, %s3705_s6  }
 0xbbb   :  { %3698 = dma.done.wait [#allocation3], 256  }
 0xbbc   :  { %3699 = vsyncadd [#allocation3], 4294967040 }
 0xbbd   :  { %2573 = vsyncpa [#allocation3], 1 }

</bundles_post_ra>
